<compile_context>
chip_gen: v6e
topology: v6e:2x2x1
jax: 0.10.0
libtpu: 0.0.40
codegen_flags: <defaults>
</compile_context>

<pallas_src>
import functools

import jax
import jax.numpy as jnp
from jax.experimental import pallas as pl
from jax.experimental.pallas import tpu as pltpu


VMEM_LIMIT = 32 * 1024 * 1024            # safe scoped-VMEM budget on v5e/v6e/v7x
WEIGHT_RESIDENT_BYTES = 8 * 1024 * 1024  # keep whole weight in VMEM below this
K_SINGLE_MAX = 4096                      # single-K-block (no scratch) threshold


# ----------------------------------------------------------------------------
# small helpers
# ----------------------------------------------------------------------------

def _round_up(x, m):
    return (x + m - 1) // m * m


def _choose_m(M, cap=256):
    Mp = _round_up(M, 8)
    if Mp <= cap:
        return Mp, Mp
    return _round_up(M, cap), cap


# ----------------------------------------------------------------------------
# generic matmul kernels with fused epilogue (bias / GELU / BN / residual)
# ----------------------------------------------------------------------------

def _mm1_kernel(*refs, has_bn, has_res, act):
    """Single-K-step matmul; no accumulator scratch, direct epilogue write."""
    x_ref, w_ref, b_ref = refs[0], refs[1], refs[2]
    pos = 3
    ss_ref = None
    r_ref = None
    if has_bn:
        ss_ref = refs[pos]; pos += 1
    if has_res:
        r_ref = refs[pos]; pos += 1
    o_ref = refs[pos]

    y = jnp.dot(x_ref[...], w_ref[...], preferred_element_type=jnp.float32)
    y = y + b_ref[...]
    if act == "gelu":
        y = jax.nn.gelu(y, approximate=True)
    if has_bn:
        y = y * ss_ref[0:1, :] + ss_ref[1:2, :]
    if has_res:
        y = y + r_ref[...].astype(jnp.float32)
    o_ref[...] = y.astype(o_ref.dtype)


def _mmk_kernel(*refs, has_bn, has_res, act):
    """K-tiled matmul with f32 VMEM accumulator (only used for very large K)."""
    x_ref, w_ref, b_ref = refs[0], refs[1], refs[2]
    pos = 3
    ss_ref = None
    r_ref = None
    if has_bn:
        ss_ref = refs[pos]; pos += 1
    if has_res:
        r_ref = refs[pos]; pos += 1
    o_ref, acc_ref = refs[pos], refs[pos + 1]

    k = pl.program_id(2)

    @pl.when(k == 0)
    def _():
        acc_ref[...] = jnp.zeros_like(acc_ref)

    acc_ref[...] += jnp.dot(x_ref[...], w_ref[...],
                            preferred_element_type=jnp.float32)

    @pl.when(k == pl.num_programs(2) - 1)
    def _():
        y = acc_ref[...] + b_ref[...]
        if act == "gelu":
            y = jax.nn.gelu(y, approximate=True)
        if has_bn:
            y = y * ss_ref[0:1, :] + ss_ref[1:2, :]
        if has_res:
            y = y + r_ref[...].astype(jnp.float32)
        o_ref[...] = y.astype(o_ref.dtype)


def matmul_fused(x, w, bias, *, act="none", scale_shift=None, residual=None,
                 out_dtype=jnp.bfloat16):
    """out = epilogue(x @ w + bias); x:[M,K], w:[K,N] (bf16), bias:[1,N] f32.

    epilogue = optional tanh-GELU, optional BatchNorm scale/shift ([2,N] f32),
    optional residual add ([M,N]).  bf16 MXU, f32 accumulate, f32 epilogue.
    """
    M, K = x.shape
    K2, N = w.shape
    assert K == K2

    x = x.astype(jnp.bfloat16)
    w = w.astype(jnp.bfloat16)
    if bias is None:
        bias = jnp.zeros((1, N), jnp.float32)
    if bias.ndim == 1:
        bias = bias.reshape(1, N).astype(jnp.float32)

    has_bn = scale_shift is not None
    has_res = residual is not None

    # --- M tiling (pad only when M is not a multiple of 8) ---
    Mp, tm = _choose_m(M)
    if Mp != M:
        x = jnp.pad(x, ((0, Mp - M), (0, 0)))
        if has_res:
            residual = jnp.pad(residual, ((0, Mp - M), (0, 0)))

    # --- N: keep the whole weight VMEM-resident when it fits; full-dim N for
    #        non-lane-aligned widths (masked stores instead of pad + slice) ---
    if N % 128 != 0 or K * N * 2 <= WEIGHT_RESIDENT_BYTES:
        tn = N
    else:
        tn = 256 if N % 256 == 0 else 128

    # --- K: single full-dim block (no pad, no scratch) when small ---
    if K <= K_SINGLE_MAX:
        tk, nk = K, 1
    else:
        Kp = _round_up(K, 512)
        tk, nk = 512, Kp // 512
        if Kp != K:
            x = jnp.pad(x, ((0, 0), (0, Kp - K)))
            w = jnp.pad(w, ((0, Kp - K), (0, 0)))

    args = [x, w, bias]
    if nk == 1:
        in_specs = [
            pl.BlockSpec((tm, tk), lambda i, j: (i, 0)),
            pl.BlockSpec((tk, tn), lambda i, j: (0, j)),
            pl.BlockSpec((1, tn), lambda i, j: (0, j)),
        ]
        if has_bn:
            in_specs.append(pl.BlockSpec((2, tn), lambda i, j: (0, j)))
            args.append(scale_shift)
        if has_res:
            in_specs.append(pl.BlockSpec((tm, tn), lambda i, j: (i, j)))
            args.append(residual)
        out = pl.pallas_call(
            functools.partial(_mm1_kernel, has_bn=has_bn, has_res=has_res, act=act),
            grid=(Mp // tm, N // tn),
            in_specs=in_specs,
            out_specs=pl.BlockSpec((tm, tn), lambda i, j: (i, j)),
            out_shape=jax.ShapeDtypeStruct((Mp, N), out_dtype),
            compiler_params=pltpu.CompilerParams(
                dimension_semantics=("parallel", "parallel"),
                vmem_limit_bytes=VMEM_LIMIT),
        )(*args)
    else:
        in_specs = [
            pl.BlockSpec((tm, tk), lambda i, j, k: (i, k)),
            pl.BlockSpec((tk, tn), lambda i, j, k: (k, j)),
            pl.BlockSpec((1, tn), lambda i, j, k: (0, j)),
        ]
        if has_bn:
            in_specs.append(pl.BlockSpec((2, tn), lambda i, j, k: (0, j)))
            args.append(scale_shift)
        if has_res:
            in_specs.append(pl.BlockSpec((tm, tn), lambda i, j, k: (i, j)))
            args.append(residual)
        out = pl.pallas_call(
            functools.partial(_mmk_kernel, has_bn=has_bn, has_res=has_res, act=act),
            grid=(Mp // tm, N // tn, nk),
            in_specs=in_specs,
            out_specs=pl.BlockSpec((tm, tn), lambda i, j, k: (i, j)),
            out_shape=jax.ShapeDtypeStruct((Mp, N), out_dtype),
            scratch_shapes=[pltpu.VMEM((tm, tn), jnp.float32)],
            compiler_params=pltpu.CompilerParams(
                dimension_semantics=("parallel", "parallel", "arbitrary"),
                vmem_limit_bytes=VMEM_LIMIT),
        )(*args)

    return out[:M] if Mp != M else out


# ----------------------------------------------------------------------------
# fused block MLP: (folded conv_input + DWT + concat + fc1) -> GELU -> fc2
# ----------------------------------------------------------------------------

def _mlp_kernel(x_ref, w1_ref, b1_ref, w2_ref, b2_ref, o_ref):
    h = jnp.dot(x_ref[...], w1_ref[...], preferred_element_type=jnp.float32)
    h = jax.nn.gelu(h + b1_ref[...], approximate=True)
    # TODO(synk): Dropout(p=0.5) between GELU and fc2 is identity (eval mode).
    h = h.astype(w2_ref.dtype)   # back to bf16 for the second MXU matmul
    o = jnp.dot(h, w2_ref[...], preferred_element_type=jnp.float32) + b2_ref[...]
    o_ref[...] = o.astype(o_ref.dtype)


def mlp_fused(x, w1, b1, w2, b2, *, out_dtype=jnp.bfloat16):
    """gelu(x @ w1 + b1) @ w2 + b2; the [tm, C*mul] intermediate stays in VMEM."""
    M, K = x.shape
    N1 = w1.shape[1]
    N2 = w2.shape[1]
    x = x.astype(jnp.bfloat16)
    Mp, tm = _choose_m(M)
    if Mp != M:
        x = jnp.pad(x, ((0, Mp - M), (0, 0)))

    out = pl.pallas_call(
        _mlp_kernel,
        grid=(Mp // tm,),
        in_specs=[
            pl.BlockSpec((tm, K), lambda i: (i, 0)),
            pl.BlockSpec((K, N1), lambda i: (0, 0)),   # weights stay resident
            pl.BlockSpec((1, N1), lambda i: (0, 0)),
            pl.BlockSpec((N1, N2), lambda i: (0, 0)),
            pl.BlockSpec((1, N2), lambda i: (0, 0)),
        ],
        out_specs=pl.BlockSpec((tm, N2), lambda i: (i, 0)),
        out_shape=jax.ShapeDtypeStruct((Mp, N2), out_dtype),
        compiler_params=pltpu.CompilerParams(
            dimension_semantics=("parallel",),
            vmem_limit_bytes=VMEM_LIMIT),
    )(x, w1.astype(jnp.bfloat16), b1, w2.astype(jnp.bfloat16), b2)
    return out[:M] if Mp != M else out


# ----------------------------------------------------------------------------
# stem convs (3x3, stride 2, pad 1) — im2col glue + fused Pallas matmul
# ----------------------------------------------------------------------------

def _im2col_s2(x, k=3, pad=1):
    """x: [B,H,W,C] -> patches [B,Ho,Wo,k*k*C] for a stride-2, pad-1 conv."""
    B, H, W, C = x.shape
    xp = jnp.pad(x, ((0, 0), (pad, pad), (pad, pad), (0, 0)))
    Ho = (H + 2 * pad - k) // 2 + 1
    Wo = (W + 2 * pad - k) // 2 + 1
    pieces = [xp[:, di:di + 2 * (Ho - 1) + 1:2, dj:dj + 2 * (Wo - 1) + 1:2, :]
              for di in range(k) for dj in range(k)]
    patches = jnp.stack(pieces, axis=3)                  # [B,Ho,Wo,k*k,C]
    return patches.reshape(B, Ho, Wo, k * k * C), Ho, Wo


def conv2d_s2(x, w_mat, b):
    """3x3 / stride 2 / pad 1 conv; w_mat: [9*Cin, Cout] bf16, b: [1,Cout] f32."""
    patches, Ho, Wo = _im2col_s2(x)
    B = x.shape[0]
    out = matmul_fused(patches.reshape(B * Ho * Wo, -1), w_mat, b)
    return out.reshape(B, Ho, Wo, w_mat.shape[1])


# ----------------------------------------------------------------------------
# quad (space-to-depth) layout + fused polyphase ConvTranspose2d(4,4,s2,p1)
# ----------------------------------------------------------------------------

PARITIES = ((0, 0), (1, 0), (0, 1), (1, 1))   # (row, col) parity = a, b, c, d
_TAPS = {0: (1, 3), 1: (2, 0)}                # parity -> (tap @ same pixel, tap @ shifted)


def to_quad(x):
    """[B,2h,2w,C] -> [B,h,w,4C]; channel blocks = pixels at parities a,b,c,d."""
    return jnp.concatenate([x[:, r::2, s::2, :] for (r, s) in PARITIES], axis=-1)


def _interleave(parts):
    """[a,b,c,d] (each [B,h,w,C]) -> [B,2h,2w,C] with out[2m+r,2n+s]=parts[(r,s)]."""
    p00, p10, p01, p11 = parts
    B, h, w, C = p00.shape
    row0 = jnp.stack([p00, p01], axis=3)
    row1 = jnp.stack([p10, p11], axis=3)
    t = jnp.stack([row0, row1], axis=2)                  # [B,h,2(r),w,2(s),C]
    return t.reshape(B, 2 * h, 2 * w, C)


def from_quad(xq):
    B, h, w, C4 = xq.shape
    C = C4 // 4
    return _interleave([xq[..., i * C:(i + 1) * C] for i in range(4)])


def neighborhood3x3(z):
    """[B,h,w,C] -> [B,h,w,9C]; channel block (di,dj) = z[m-1+di, n-1+dj], zero-padded."""
    B, h, w, C = z.shape
    zp = jnp.pad(z, ((0, 0), (1, 1), (1, 1), (0, 0)))
    blocks = [zp[:, di:di + h, dj:dj + w, :] for di in range(3) for dj in range(3)]
    return jnp.concatenate(blocks, axis=-1)


def fold_deconv_9(wt):
    """PyTorch ConvTranspose2d weight [Cin,Cout,4,4] (stride 2, pad 1) -> one
    matmul weight [9*Cin, 4*Cout] that consumes the 3x3 neighborhood of the
    input and emits the quad (parity) layout of the 2x-upsampled output."""
    Cin, Cout = wt.shape[0], wt.shape[1]
    Wall = jnp.zeros((9 * Cin, 4 * Cout), jnp.float32)
    for pi, (r, s) in enumerate(PARITIES):
        ka, kb = _TAPS[r]               # row kernel taps (same / shifted)
        la, lb = _TAPS[s]               # col kernel taps
        di_sh = 0 if r == 0 else 2      # neighbor row offset index (0: m-1, 2: m+1)
        dj_sh = 0 if s == 0 else 2
        for di, dj, kh, kw in ((1, 1, ka, la), (di_sh, 1, kb, la),
                               (1, dj_sh, ka, lb), (di_sh, dj_sh, kb, lb)):
            idx = 3 * di + dj
            Wall = Wall.at[idx * Cin:(idx + 1) * Cin,
                           pi * Cout:(pi + 1) * Cout].set(wt[:, :, kh, kw])
    return Wall


def conv_transpose2d_quad(x, w_all, b4, *, scale_shift=None, residual_q=None):
    """ConvTranspose2d(4,4,s2,p1) as ONE fused matmul on x's 3x3 neighborhood.

    x: [B,h,w,Cin] -> quad output [B,h,w,4*Cout]; optional fused BatchNorm
    scale/shift ([2,4*Cout]) and quad residual (WaveMix block).  Use
    from_quad() to obtain the interleaved full-resolution tensor.
    """
    B, h, w, Cin = x.shape
    M = B * h * w
    nb = neighborhood3x3(x).reshape(M, 9 * Cin)
    res = None if residual_q is None else residual_q.reshape(M, -1)
    out = matmul_fused(nb, w_all, b4, scale_shift=scale_shift, residual=res)
    return out.reshape(B, h, w, -1)


# ----------------------------------------------------------------------------
# WaveMixLite block (entirely in quad layout)
# ----------------------------------------------------------------------------

def wavemix_block_quad(xq, p):
    """conv_input(1x1)+DWT+concat+fc1 folded into one weight and run with fc2
    in a fused MLP kernel; ConvTranspose2d + BatchNorm(eval) + residual run as
    one fused matmul whose [M,4C] output is directly the next block's input."""
    B, h, w, C4 = xq.shape
    C = C4 // 4
    z = mlp_fused(xq.reshape(B * h * w, C4), p["mlp_w1"], p["mlp_b1"],
                  p["mlp_w2"], p["mlp_b2"])
    z = z.reshape(B, h, w, C)
    return conv_transpose2d_quad(z, p["dec_w"], p["dec_b"],
                                 scale_shift=p["dec_ss"], residual_q=xq)


# ----------------------------------------------------------------------------
# full model forward
# ----------------------------------------------------------------------------

def wavemix_segmentation_forward(x_nchw, params):
    """x_nchw: [B, 3, H, W] f32 -> [B, num_class, H, W] f32."""
    x = jnp.transpose(x_nchw, (0, 2, 3, 1)).astype(jnp.bfloat16)   # NHWC, bf16

    # stem: Conv(3 -> C/2, 3x3 s2 p1), Conv(C/2 -> C, 3x3 s2 p1)
    x = conv2d_s2(x, params["conv0_w"], params["conv0_b"])
    x = conv2d_s2(x, params["conv1_w"], params["conv1_b"])

    # blocks run in quad layout; a single interleave after the last block
    xq = to_quad(x)
    for bp in params["blocks"]:
        xq = wavemix_block_quad(xq, bp)
    x = from_quad(xq)

    # decoder: ConvT(C -> C/2), ConvT(C/2 -> C/4), each one fused matmul
    x = from_quad(conv_transpose2d_quad(x, params["convT0_w"], params["convT0_b"]))
    x = from_quad(conv_transpose2d_quad(x, params["convT1_w"], params["convT1_b"]))

    # segmentation head: 1x1 conv C/4 -> num_class (full-dim K and N, no pads)
    B, H, W, Cq = x.shape
    y = matmul_fused(x.reshape(B * H * W, Cq), params["seg_w"], params["seg_b"],
                     out_dtype=jnp.float32)
    nc = y.shape[1]
    return jnp.transpose(y.reshape(B, H, W, nc), (0, 3, 1, 2))      # NCHW


# ----------------------------------------------------------------------------
# deterministic parameter construction (PyTorch layouts -> folded bf16 forms)
# ----------------------------------------------------------------------------

def make_params(key, num_class, num_block, C, mul):
    def nrm(k, shape, scale=0.05):
        return (scale * jax.random.normal(k, shape)).astype(jnp.float32)

    def b16(a):
        return a.astype(jnp.bfloat16)

    def row32(v):
        return v.reshape(1, -1).astype(jnp.float32)

    keys = iter(jax.random.split(key, 16 + 8 * num_block))
    nk = lambda: next(keys)
    C4 = C // 4

    # Haar combination: cat(ll,lh,hl,hh) = [a,b,c,d] @ T, T = 0.5*kron(S, I_{C/4})
    S = jnp.array([[1, 1, 1, 1],
                   [1, 1, -1, -1],
                   [1, -1, 1, -1],
                   [1, -1, -1, 1]], jnp.float32)
    T = 0.5 * jnp.kron(S, jnp.eye(C4, dtype=jnp.float32))

    params = {}
    w0 = nrm(nk(), (C // 2, 3, 3, 3))
    params["conv0_w"] = b16(jnp.transpose(w0, (2, 3, 1, 0)).reshape(27, C // 2))
    params["conv0_b"] = row32(nrm(nk(), (C // 2,)))
    w1 = nrm(nk(), (C, C // 2, 3, 3))
    params["conv1_w"] = b16(jnp.transpose(w1, (2, 3, 1, 0)).reshape(9 * (C // 2), C))
    params["conv1_b"] = row32(nrm(nk(), (C,)))

    bn_eps = 1e-5
    blocks = []
    for _ in range(num_block):
        w_ci = nrm(nk(), (C4, C, 1, 1));       b_ci = nrm(nk(), (C4,))
        w_f1 = nrm(nk(), (C * mul, C, 1, 1));  b_f1 = nrm(nk(), (C * mul,))
        w_f2 = nrm(nk(), (C, C * mul, 1, 1));  b_f2 = nrm(nk(), (C,))
        ct_w = nrm(nk(), (C, C, 4, 4));        ct_b = nrm(nk(), (C,))
        # BatchNorm2d (eval) with freshly-initialized stats:
        # gamma=1, beta=0, running_mean=0, running_var=1.
        scale = jnp.ones((C,), jnp.float32) / jnp.sqrt(1.0 + bn_eps)
        shift = jnp.zeros((C,), jnp.float32)

        Wci = w_ci[:, :, 0, 0].T               # [C, C/4]
        W1 = w_f1[:, :, 0, 0].T                # [C, C*mul]
        TW1 = T @ W1
        blocks.append({
            # conv_input(1x1) + DWT + concat folded into fc1 (linear in quad vec):
            "mlp_w1": b16(jnp.kron(jnp.eye(4, dtype=jnp.float32), Wci) @ TW1),
            "mlp_b1": row32(jnp.tile(b_ci, 4) @ TW1 + b_f1),
            "mlp_w2": b16(w_f2[:, :, 0, 0].T),
            "mlp_b2": row32(b_f2),
            # ConvTranspose2d folded into one 3x3-neighborhood matmul emitting
            # the quad layout; bias / BN scale-shift tiled across parities.
            "dec_w": b16(fold_deconv_9(ct_w)),
            "dec_b": row32(jnp.tile(ct_b, 4)),
            "dec_ss": jnp.stack([jnp.tile(scale, 4), jnp.tile(shift, 4)], axis=0),
        })
    params["blocks"] = blocks

    params["convT0_w"] = b16(fold_deconv_9(nrm(nk(), (C, C // 2, 4, 4))))
    params["convT0_b"] = row32(jnp.tile(nrm(nk(), (C // 2,)), 4))
    params["convT1_w"] = b16(fold_deconv_9(nrm(nk(), (C // 2, C // 4, 4, 4))))
    params["convT1_b"] = row32(jnp.tile(nrm(nk(), (C // 4,)), 4))

    w_seg = nrm(nk(), (num_class, C4, 1, 1))
    params["seg_w"] = b16(w_seg[:, :, 0, 0].T)
    params["seg_b"] = row32(nrm(nk(), (num_class,)))
    return params


# ----------------------------------------------------------------------------
# Main
# ----------------------------------------------------------------------------

if __name__ == "__main__":
    B, H, W = 2, 16, 16          # small, module-consistent shapes
    dim_channel = 32             # must be divisible by 4
    num_block = 2
    mul_factor = 2
    num_class = 6

    key = jax.random.PRNGKey(0)
    k_x, k_p = jax.random.split(key)
    x = jax.random.normal(k_x, (B, 3, H, W), dtype=jnp.float32)
    params = make_params(k_p, num_class, num_block, dim_channel, mul_factor)

    fwd = jax.jit(wavemix_segmentation_forward)
    out = jax.block_until_ready(fwd(x, params))

    assert out.shape == (B, num_class, H, W), out.shape
    assert bool(jnp.all(jnp.isfinite(out)))
    print("KERNEL_OK")
</pallas_src>

<mosaic_0001>
module attributes {stable_mosaic.version = 11 : i64} {
  func.func @_mm1_kernel(%arg0: i32, %arg1: i32, %arg2: memref<128x27xbf16, #tpu.memory_space<vmem>>, %arg3: memref<27x16xbf16, #tpu.memory_space<vmem>>, %arg4: memref<1x16xf32, #tpu.memory_space<vmem>>, %arg5: memref<128x16xbf16, #tpu.memory_space<vmem>>) attributes {dimension_semantics = [#tpu.dimension_semantics<parallel>, #tpu.dimension_semantics<parallel>], iteration_bounds = array<i64: 1, 1>, scalar_prefetch = 0 : i64, scratch_operands = 0 : i64, tpu.core_type = #tpu.core_type<tc>, window_params = [{transform_indices = @transform_0, window_bounds = array<i64: 128, 27>}, {transform_indices = @transform_1, window_bounds = array<i64: 27, 16>}, {transform_indices = @transform_2, window_bounds = array<i64: 1, 16>}, {transform_indices = @transform_3, window_bounds = array<i64: 128, 16>}]} {
    %c0 = arith.constant 0 : index
    %c0_0 = arith.constant 0 : index
    %0 = vector.load %arg2[%c0, %c0_0] : memref<128x27xbf16, #tpu.memory_space<vmem>>, vector<128x27xbf16>
    %c0_1 = arith.constant 0 : index
    %c0_2 = arith.constant 0 : index
    %1 = vector.load %arg3[%c0_1, %c0_2] : memref<27x16xbf16, #tpu.memory_space<vmem>>, vector<27x16xbf16>
    %cst = arith.constant dense<0.000000e+00> : vector<128x16xf32>
    %2 = tpu.matmul %0, %1, %cst {dimension_numbers = #tpu.dot_dimension_numbers<[1], [0], [0], [1], [0, 0, 1, 1], [], []>} : vector<128x27xbf16>, vector<27x16xbf16>, vector<128x16xf32> -> vector<128x16xf32>
    %c0_3 = arith.constant 0 : index
    %c0_4 = arith.constant 0 : index
    %3 = vector.load %arg4[%c0_3, %c0_4] : memref<1x16xf32, #tpu.memory_space<vmem>>, vector<1x16xf32>
    %4 = vector.broadcast %3 : vector<1x16xf32> to vector<128x16xf32>
    %5 = arith.addf %2, %4 : vector<128x16xf32>
    %6 = arith.truncf %5 : vector<128x16xf32> to vector<128x16xbf16>
    %c0_5 = arith.constant 0 : index
    %c0_6 = arith.constant 0 : index
    %7 = vector.load %arg5[%c0_5, %c0_6] : memref<128x16xbf16, #tpu.memory_space<vmem>>, vector<128x16xbf16>
    tpu.vector_store %arg5[%c0_5, %c0_6], %6 {strides = array<i32>} : memref<128x16xbf16, #tpu.memory_space<vmem>>, vector<128x16xbf16>,
    return
  }
  func.func @transform_0(%arg0: i32, %arg1: i32) -> (i32, i32) {
    %c0_i32 = arith.constant 0 : i32
    %c0_i32_0 = arith.constant 0 : i32
    return %arg0, %c0_i32 : i32, i32
  }
  func.func @transform_1(%arg0: i32, %arg1: i32) -> (i32, i32) {
    %c0_i32 = arith.constant 0 : i32
    %c0_i32_0 = arith.constant 0 : i32
    return %c0_i32, %arg1 : i32, i32
  }
  func.func @transform_2(%arg0: i32, %arg1: i32) -> (i32, i32) {
    %c0_i32 = arith.constant 0 : i32
    %c0_i32_0 = arith.constant 0 : i32
    return %c0_i32, %arg1 : i32, i32
  }
  func.func @transform_3(%arg0: i32, %arg1: i32) -> (i32, i32) {
    %c0_i32 = arith.constant 0 : i32
    return %arg0, %arg1 : i32, i32
  }
}

module attributes {stable_mosaic.version = 11 : i64} {
  func.func @_mm1_kernel(%arg0: i32, %arg1: i32, %arg2: memref<32x144xbf16, #tpu.memory_space<vmem>>, %arg3: memref<144x32xbf16, #tpu.memory_space<vmem>>, %arg4: memref<1x32xf32, #tpu.memory_space<vmem>>, %arg5: memref<32x32xbf16, #tpu.memory_space<vmem>>) attributes {dimension_semantics = [#tpu.dimension_semantics<parallel>, #tpu.dimension_semantics<parallel>], iteration_bounds = array<i64: 1, 1>, scalar_prefetch = 0 : i64, scratch_operands = 0 : i64, tpu.core_type = #tpu.core_type<tc>, window_params = [{transform_indices = @transform_0, window_bounds = array<i64: 32, 144>}, {transform_indices = @transform_1, window_bounds = array<i64: 144, 32>}, {transform_indices = @transform_2, window_bounds = array<i64: 1, 32>}, {transform_indices = @transform_3, window_bounds = array<i64: 32, 32>}]} {
    %c0 = arith.constant 0 : index
    %c0_0 = arith.constant 0 : index
    %0 = vector.load %arg2[%c0, %c0_0] : memref<32x144xbf16, #tpu.memory_space<vmem>>, vector<32x144xbf16>
    %c0_1 = arith.constant 0 : index
    %c0_2 = arith.constant 0 : index
    %1 = vector.load %arg3[%c0_1, %c0_2] : memref<144x32xbf16, #tpu.memory_space<vmem>>, vector<144x32xbf16>
    %cst = arith.constant dense<0.000000e+00> : vector<32x32xf32>
    %2 = tpu.matmul %0, %1, %cst {dimension_numbers = #tpu.dot_dimension_numbers<[1], [0], [0], [1], [0, 0, 1, 1], [], []>} : vector<32x144xbf16>, vector<144x32xbf16>, vector<32x32xf32> -> vector<32x32xf32>
    %c0_3 = arith.constant 0 : index
    %c0_4 = arith.constant 0 : index
    %3 = vector.load %arg4[%c0_3, %c0_4] : memref<1x32xf32, #tpu.memory_space<vmem>>, vector<1x32xf32>
    %4 = vector.broadcast %3 : vector<1x32xf32> to vector<32x32xf32>
    %5 = arith.addf %2, %4 : vector<32x32xf32>
    %6 = arith.truncf %5 : vector<32x32xf32> to vector<32x32xbf16>
    %c0_5 = arith.constant 0 : index
    %c0_6 = arith.constant 0 : index
    %7 = vector.load %arg5[%c0_5, %c0_6] : memref<32x32xbf16, #tpu.memory_space<vmem>>, vector<32x32xbf16>
    tpu.vector_store %arg5[%c0_5, %c0_6], %6 {strides = array<i32>} : memref<32x32xbf16, #tpu.memory_space<vmem>>, vector<32x32xbf16>,
    return
  }
  func.func @transform_0(%arg0: i32, %arg1: i32) -> (i32, i32) {
    %c0_i32 = arith.constant 0 : i32
    %c0_i32_0 = arith.constant 0 : i32
    return %arg0, %c0_i32 : i32, i32
  }
  func.func @transform_1(%arg0: i32, %arg1: i32) -> (i32, i32) {
    %c0_i32 = arith.constant 0 : i32
    %c0_i32_0 = arith.constant 0 : i32
    return %c0_i32, %arg1 : i32, i32
  }
  func.func @transform_2(%arg0: i32, %arg1: i32) -> (i32, i32) {
    %c0_i32 = arith.constant 0 : i32
    %c0_i32_0 = arith.constant 0 : i32
    return %c0_i32, %arg1 : i32, i32
  }
  func.func @transform_3(%arg0: i32, %arg1: i32) -> (i32, i32) {
    %c0_i32 = arith.constant 0 : i32
    return %arg0, %arg1 : i32, i32
  }
}

module attributes {stable_mosaic.version = 11 : i64} {
  func.func @_mlp_kernel(%arg0: i32, %arg1: memref<8x128xbf16, #tpu.memory_space<vmem>>, %arg2: memref<128x64xbf16, #tpu.memory_space<vmem>>, %arg3: memref<1x64xf32, #tpu.memory_space<vmem>>, %arg4: memref<64x32xbf16, #tpu.memory_space<vmem>>, %arg5: memref<1x32xf32, #tpu.memory_space<vmem>>, %arg6: memref<8x32xbf16, #tpu.memory_space<vmem>>) attributes {dimension_semantics = [#tpu.dimension_semantics<parallel>], iteration_bounds = array<i64: 1>, scalar_prefetch = 0 : i64, scratch_operands = 0 : i64, tpu.core_type = #tpu.core_type<tc>, window_params = [{transform_indices = @transform_0, window_bounds = array<i64: 8, 128>}, {pipeline_mode = #tpu.pipeline_mode<synchronous>, transform_indices = @transform_1, window_bounds = array<i64: 128, 64>}, {pipeline_mode = #tpu.pipeline_mode<synchronous>, transform_indices = @transform_2, window_bounds = array<i64: 1, 64>}, {pipeline_mode = #tpu.pipeline_mode<synchronous>, transform_indices = @transform_3, window_bounds = array<i64: 64, 32>}, {pipeline_mode = #tpu.pipeline_mode<synchronous>, transform_indices = @transform_4, window_bounds = array<i64: 1, 32>}, {transform_indices = @transform_5, window_bounds = array<i64: 8, 32>}]} {
    %c0 = arith.constant 0 : index
    %c0_0 = arith.constant 0 : index
    %0 = vector.load %arg1[%c0, %c0_0] : memref<8x128xbf16, #tpu.memory_space<vmem>>, vector<8x128xbf16>
    %c0_1 = arith.constant 0 : index
    %c0_2 = arith.constant 0 : index
    %1 = vector.load %arg2[%c0_1, %c0_2] : memref<128x64xbf16, #tpu.memory_space<vmem>>, vector<128x64xbf16>
    %cst = arith.constant dense<0.000000e+00> : vector<8x64xf32>
    %2 = tpu.matmul %0, %1, %cst {dimension_numbers = #tpu.dot_dimension_numbers<[1], [0], [0], [1], [0, 0, 1, 1], [], []>} : vector<8x128xbf16>, vector<128x64xbf16>, vector<8x64xf32> -> vector<8x64xf32>
    %c0_3 = arith.constant 0 : index
    %c0_4 = arith.constant 0 : index
    %3 = vector.load %arg3[%c0_3, %c0_4] : memref<1x64xf32, #tpu.memory_space<vmem>>, vector<1x64xf32>
    %4 = vector.broadcast %3 : vector<1x64xf32> to vector<8x64xf32>
    %5 = arith.addf %2, %4 : vector<8x64xf32>
    %6 = arith.mulf %5, %5 : vector<8x64xf32>
    %7 = arith.mulf %5, %6 : vector<8x64xf32>
    %cst_5 = arith.constant 4.471500e-02 : f32
    %8 = vector.broadcast %cst_5 : f32 to vector<8x64xf32>
    %9 = arith.mulf %8, %7 : vector<8x64xf32>
    %10 = arith.addf %5, %9 : vector<8x64xf32>
    %cst_6 = arith.constant 0.797884583 : f32
    %11 = vector.broadcast %cst_6 : f32 to vector<8x64xf32>
    %12 = arith.mulf %11, %10 : vector<8x64xf32>
    %13 = math.tanh %12 : vector<8x64xf32>
    %cst_7 = arith.constant 1.000000e+00 : f32
    %14 = vector.broadcast %cst_7 : f32 to vector<8x64xf32>
    %15 = arith.addf %14, %13 : vector<8x64xf32>
    %cst_8 = arith.constant 5.000000e-01 : f32
    %16 = vector.broadcast %cst_8 : f32 to vector<8x64xf32>
    %17 = arith.mulf %16, %15 : vector<8x64xf32>
    %18 = arith.mulf %5, %17 : vector<8x64xf32>
    %19 = arith.truncf %18 : vector<8x64xf32> to vector<8x64xbf16>
    %c0_9 = arith.constant 0 : index
    %c0_10 = arith.constant 0 : index
    %20 = vector.load %arg4[%c0_9, %c0_10] : memref<64x32xbf16, #tpu.memory_space<vmem>>, vector<64x32xbf16>
    %cst_11 = arith.constant dense<0.000000e+00> : vector<8x32xf32>
    %21 = tpu.matmul %19, %20, %cst_11 {dimension_numbers = #tpu.dot_dimension_numbers<[1], [0], [0], [1], [0, 0, 1, 1], [], []>} : vector<8x64xbf16>, vector<64x32xbf16>, vector<8x32xf32> -> vector<8x32xf32>
    %c0_12 = arith.constant 0 : index
    %c0_13 = arith.constant 0 : index
    %22 = vector.load %arg5[%c0_12, %c0_13] : memref<1x32xf32, #tpu.memory_space<vmem>>, vector<1x32xf32>
    %23 = vector.broadcast %22 : vector<1x32xf32> to vector<8x32xf32>
    %24 = arith.addf %21, %23 : vector<8x32xf32>
    %25 = arith.truncf %24 : vector<8x32xf32> to vector<8x32xbf16>
    %c0_14 = arith.constant 0 : index
    %c0_15 = arith.constant 0 : index
    %26 = vector.load %arg6[%c0_14, %c0_15] : memref<8x32xbf16, #tpu.memory_space<vmem>>, vector<8x32xbf16>
    tpu.vector_store %arg6[%c0_14, %c0_15], %25 {strides = array<i32>} : memref<8x32xbf16, #tpu.memory_space<vmem>>, vector<8x32xbf16>,
    return
  }
  func.func @transform_0(%arg0: i32) -> (i32, i32) {
    %c0_i32 = arith.constant 0 : i32
    %c0_i32_0 = arith.constant 0 : i32
    return %arg0, %c0_i32 : i32, i32
  }
  func.func @transform_1(%arg0: i32) -> (i32, i32) {
    %c0_i32 = arith.constant 0 : i32
    %c0_i32_0 = arith.constant 0 : i32
    %c0_i32_1 = arith.constant 0 : i32
    return %c0_i32, %c0_i32_0 : i32, i32
  }
  func.func @transform_2(%arg0: i32) -> (i32, i32) {
    %c0_i32 = arith.constant 0 : i32
    %c0_i32_0 = arith.constant 0 : i32
    %c0_i32_1 = arith.constant 0 : i32
    return %c0_i32, %c0_i32_0 : i32, i32
  }
  func.func @transform_3(%arg0: i32) -> (i32, i32) {
    %c0_i32 = arith.constant 0 : i32
    %c0_i32_0 = arith.constant 0 : i32
    %c0_i32_1 = arith.constant 0 : i32
    return %c0_i32, %c0_i32_0 : i32, i32
  }
  func.func @transform_4(%arg0: i32) -> (i32, i32) {
    %c0_i32 = arith.constant 0 : i32
    %c0_i32_0 = arith.constant 0 : i32
    %c0_i32_1 = arith.constant 0 : i32
    return %c0_i32, %c0_i32_0 : i32, i32
  }
  func.func @transform_5(%arg0: i32) -> (i32, i32) {
    %c0_i32 = arith.constant 0 : i32
    %c0_i32_0 = arith.constant 0 : i32
    return %arg0, %c0_i32 : i32, i32
  }
}

module attributes {stable_mosaic.version = 11 : i64} {
  func.func @_mm1_kernel(%arg0: i32, %arg1: i32, %arg2: memref<8x288xbf16, #tpu.memory_space<vmem>>, %arg3: memref<288x128xbf16, #tpu.memory_space<vmem>>, %arg4: memref<1x128xf32, #tpu.memory_space<vmem>>, %arg5: memref<2x128xf32, #tpu.memory_space<vmem>>, %arg6: memref<8x128xbf16, #tpu.memory_space<vmem>>, %arg7: memref<8x128xbf16, #tpu.memory_space<vmem>>) attributes {dimension_semantics = [#tpu.dimension_semantics<parallel>, #tpu.dimension_semantics<parallel>], iteration_bounds = array<i64: 1, 1>, scalar_prefetch = 0 : i64, scratch_operands = 0 : i64, tpu.core_type = #tpu.core_type<tc>, window_params = [{transform_indices = @transform_0, window_bounds = array<i64: 8, 288>}, {transform_indices = @transform_1, window_bounds = array<i64: 288, 128>}, {transform_indices = @transform_2, window_bounds = array<i64: 1, 128>}, {transform_indices = @transform_3, window_bounds = array<i64: 2, 128>}, {transform_indices = @transform_4, window_bounds = array<i64: 8, 128>}, {transform_indices = @transform_5, window_bounds = array<i64: 8, 128>}]} {
    %c0 = arith.constant 0 : index
    %c0_0 = arith.constant 0 : index
    %0 = vector.load %arg2[%c0, %c0_0] : memref<8x288xbf16, #tpu.memory_space<vmem>>, vector<8x288xbf16>
    %c0_1 = arith.constant 0 : index
    %c0_2 = arith.constant 0 : index
    %1 = vector.load %arg3[%c0_1, %c0_2] : memref<288x128xbf16, #tpu.memory_space<vmem>>, vector<288x128xbf16>
    %cst = arith.constant dense<0.000000e+00> : vector<8x128xf32>
    %2 = tpu.matmul %0, %1, %cst {dimension_numbers = #tpu.dot_dimension_numbers<[1], [0], [0], [1], [0, 0, 1, 1], [], []>} : vector<8x288xbf16>, vector<288x128xbf16>, vector<8x128xf32> -> vector<8x128xf32>
    %c0_3 = arith.constant 0 : index
    %c0_4 = arith.constant 0 : index
    %3 = vector.load %arg4[%c0_3, %c0_4] : memref<1x128xf32, #tpu.memory_space<vmem>>, vector<1x128xf32>
    %4 = vector.broadcast %3 : vector<1x128xf32> to vector<8x128xf32>
    %5 = arith.addf %2, %4 : vector<8x128xf32>
    %c0_5 = arith.constant 0 : index
    %c0_6 = arith.constant 0 : index
    %6 = vector.load %arg5[%c0_5, %c0_6] : memref<2x128xf32, #tpu.memory_space<vmem>>, vector<1x128xf32>
    %7 = vector.broadcast %6 : vector<1x128xf32> to vector<8x128xf32>
    %8 = arith.mulf %5, %7 : vector<8x128xf32>
    %c1 = arith.constant 1 : index
    %c0_7 = arith.constant 0 : index
    %9 = vector.load %arg5[%c1, %c0_7] : memref<2x128xf32, #tpu.memory_space<vmem>>, vector<1x128xf32>
    %10 = vector.broadcast %9 : vector<1x128xf32> to vector<8x128xf32>
    %11 = arith.addf %8, %10 : vector<8x128xf32>
    %c0_8 = arith.constant 0 : index
    %c0_9 = arith.constant 0 : index
    %12 = vector.load %arg6[%c0_8, %c0_9] : memref<8x128xbf16, #tpu.memory_space<vmem>>, vector<8x128xbf16>
    %13 = arith.extf %12 : vector<8x128xbf16> to vector<8x128xf32>
    %14 = arith.addf %11, %13 : vector<8x128xf32>
    %15 = arith.truncf %14 : vector<8x128xf32> to vector<8x128xbf16>
    %c0_10 = arith.constant 0 : index
    %c0_11 = arith.constant 0 : index
    %16 = vector.load %arg7[%c0_10, %c0_11] : memref<8x128xbf16, #tpu.memory_space<vmem>>, vector<8x128xbf16>
    tpu.vector_store %arg7[%c0_10, %c0_11], %15 {strides = array<i32>} : memref<8x128xbf16, #tpu.memory_space<vmem>>, vector<8x128xbf16>,
    return
  }
  func.func @transform_0(%arg0: i32, %arg1: i32) -> (i32, i32) {
    %c0_i32 = arith.constant 0 : i32
    %c0_i32_0 = arith.constant 0 : i32
    return %arg0, %c0_i32 : i32, i32
  }
  func.func @transform_1(%arg0: i32, %arg1: i32) -> (i32, i32) {
    %c0_i32 = arith.constant 0 : i32
    %c0_i32_0 = arith.constant 0 : i32
    return %c0_i32, %arg1 : i32, i32
  }
  func.func @transform_2(%arg0: i32, %arg1: i32) -> (i32, i32) {
    %c0_i32 = arith.constant 0 : i32
    %c0_i32_0 = arith.constant 0 : i32
    return %c0_i32, %arg1 : i32, i32
  }
  func.func @transform_3(%arg0: i32, %arg1: i32) -> (i32, i32) {
    %c0_i32 = arith.constant 0 : i32
    %c0_i32_0 = arith.constant 0 : i32
    return %c0_i32, %arg1 : i32, i32
  }
  func.func @transform_4(%arg0: i32, %arg1: i32) -> (i32, i32) {
    %c0_i32 = arith.constant 0 : i32
    return %arg0, %arg1 : i32, i32
  }
  func.func @transform_5(%arg0: i32, %arg1: i32) -> (i32, i32) {
    %c0_i32 = arith.constant 0 : i32
    return %arg0, %arg1 : i32, i32
  }
}

module attributes {stable_mosaic.version = 11 : i64} {
  func.func @_mm1_kernel(%arg0: i32, %arg1: i32, %arg2: memref<32x288xbf16, #tpu.memory_space<vmem>>, %arg3: memref<288x64xbf16, #tpu.memory_space<vmem>>, %arg4: memref<1x64xf32, #tpu.memory_space<vmem>>, %arg5: memref<32x64xbf16, #tpu.memory_space<vmem>>) attributes {dimension_semantics = [#tpu.dimension_semantics<parallel>, #tpu.dimension_semantics<parallel>], iteration_bounds = array<i64: 1, 1>, scalar_prefetch = 0 : i64, scratch_operands = 0 : i64, tpu.core_type = #tpu.core_type<tc>, window_params = [{transform_indices = @transform_0, window_bounds = array<i64: 32, 288>}, {transform_indices = @transform_1, window_bounds = array<i64: 288, 64>}, {transform_indices = @transform_2, window_bounds = array<i64: 1, 64>}, {transform_indices = @transform_3, window_bounds = array<i64: 32, 64>}]} {
    %c0 = arith.constant 0 : index
    %c0_0 = arith.constant 0 : index
    %0 = vector.load %arg2[%c0, %c0_0] : memref<32x288xbf16, #tpu.memory_space<vmem>>, vector<32x288xbf16>
    %c0_1 = arith.constant 0 : index
    %c0_2 = arith.constant 0 : index
    %1 = vector.load %arg3[%c0_1, %c0_2] : memref<288x64xbf16, #tpu.memory_space<vmem>>, vector<288x64xbf16>
    %cst = arith.constant dense<0.000000e+00> : vector<32x64xf32>
    %2 = tpu.matmul %0, %1, %cst {dimension_numbers = #tpu.dot_dimension_numbers<[1], [0], [0], [1], [0, 0, 1, 1], [], []>} : vector<32x288xbf16>, vector<288x64xbf16>, vector<32x64xf32> -> vector<32x64xf32>
    %c0_3 = arith.constant 0 : index
    %c0_4 = arith.constant 0 : index
    %3 = vector.load %arg4[%c0_3, %c0_4] : memref<1x64xf32, #tpu.memory_space<vmem>>, vector<1x64xf32>
    %4 = vector.broadcast %3 : vector<1x64xf32> to vector<32x64xf32>
    %5 = arith.addf %2, %4 : vector<32x64xf32>
    %6 = arith.truncf %5 : vector<32x64xf32> to vector<32x64xbf16>
    %c0_5 = arith.constant 0 : index
    %c0_6 = arith.constant 0 : index
    %7 = vector.load %arg5[%c0_5, %c0_6] : memref<32x64xbf16, #tpu.memory_space<vmem>>, vector<32x64xbf16>
    tpu.vector_store %arg5[%c0_5, %c0_6], %6 {strides = array<i32>} : memref<32x64xbf16, #tpu.memory_space<vmem>>, vector<32x64xbf16>,
    return
  }
  func.func @transform_0(%arg0: i32, %arg1: i32) -> (i32, i32) {
    %c0_i32 = arith.constant 0 : i32
    %c0_i32_0 = arith.constant 0 : i32
    return %arg0, %c0_i32 : i32, i32
  }
  func.func @transform_1(%arg0: i32, %arg1: i32) -> (i32, i32) {
    %c0_i32 = arith.constant 0 : i32
    %c0_i32_0 = arith.constant 0 : i32
    return %c0_i32, %arg1 : i32, i32
  }
  func.func @transform_2(%arg0: i32, %arg1: i32) -> (i32, i32) {
    %c0_i32 = arith.constant 0 : i32
    %c0_i32_0 = arith.constant 0 : i32
    return %c0_i32, %arg1 : i32, i32
  }
  func.func @transform_3(%arg0: i32, %arg1: i32) -> (i32, i32) {
    %c0_i32 = arith.constant 0 : i32
    return %arg0, %arg1 : i32, i32
  }
}

module attributes {stable_mosaic.version = 11 : i64} {
  func.func @_mm1_kernel(%arg0: i32, %arg1: i32, %arg2: memref<128x144xbf16, #tpu.memory_space<vmem>>, %arg3: memref<144x32xbf16, #tpu.memory_space<vmem>>, %arg4: memref<1x32xf32, #tpu.memory_space<vmem>>, %arg5: memref<128x32xbf16, #tpu.memory_space<vmem>>) attributes {dimension_semantics = [#tpu.dimension_semantics<parallel>, #tpu.dimension_semantics<parallel>], iteration_bounds = array<i64: 1, 1>, scalar_prefetch = 0 : i64, scratch_operands = 0 : i64, tpu.core_type = #tpu.core_type<tc>, window_params = [{transform_indices = @transform_0, window_bounds = array<i64: 128, 144>}, {transform_indices = @transform_1, window_bounds = array<i64: 144, 32>}, {transform_indices = @transform_2, window_bounds = array<i64: 1, 32>}, {transform_indices = @transform_3, window_bounds = array<i64: 128, 32>}]} {
    %c0 = arith.constant 0 : index
    %c0_0 = arith.constant 0 : index
    %0 = vector.load %arg2[%c0, %c0_0] : memref<128x144xbf16, #tpu.memory_space<vmem>>, vector<128x144xbf16>
    %c0_1 = arith.constant 0 : index
    %c0_2 = arith.constant 0 : index
    %1 = vector.load %arg3[%c0_1, %c0_2] : memref<144x32xbf16, #tpu.memory_space<vmem>>, vector<144x32xbf16>
    %cst = arith.constant dense<0.000000e+00> : vector<128x32xf32>
    %2 = tpu.matmul %0, %1, %cst {dimension_numbers = #tpu.dot_dimension_numbers<[1], [0], [0], [1], [0, 0, 1, 1], [], []>} : vector<128x144xbf16>, vector<144x32xbf16>, vector<128x32xf32> -> vector<128x32xf32>
    %c0_3 = arith.constant 0 : index
    %c0_4 = arith.constant 0 : index
    %3 = vector.load %arg4[%c0_3, %c0_4] : memref<1x32xf32, #tpu.memory_space<vmem>>, vector<1x32xf32>
    %4 = vector.broadcast %3 : vector<1x32xf32> to vector<128x32xf32>
    %5 = arith.addf %2, %4 : vector<128x32xf32>
    %6 = arith.truncf %5 : vector<128x32xf32> to vector<128x32xbf16>
    %c0_5 = arith.constant 0 : index
    %c0_6 = arith.constant 0 : index
    %7 = vector.load %arg5[%c0_5, %c0_6] : memref<128x32xbf16, #tpu.memory_space<vmem>>, vector<128x32xbf16>
    tpu.vector_store %arg5[%c0_5, %c0_6], %6 {strides = array<i32>} : memref<128x32xbf16, #tpu.memory_space<vmem>>, vector<128x32xbf16>,
    return
  }
  func.func @transform_0(%arg0: i32, %arg1: i32) -> (i32, i32) {
    %c0_i32 = arith.constant 0 : i32
    %c0_i32_0 = arith.constant 0 : i32
    return %arg0, %c0_i32 : i32, i32
  }
  func.func @transform_1(%arg0: i32, %arg1: i32) -> (i32, i32) {
    %c0_i32 = arith.constant 0 : i32
    %c0_i32_0 = arith.constant 0 : i32
    return %c0_i32, %arg1 : i32, i32
  }
  func.func @transform_2(%arg0: i32, %arg1: i32) -> (i32, i32) {
    %c0_i32 = arith.constant 0 : i32
    %c0_i32_0 = arith.constant 0 : i32
    return %c0_i32, %arg1 : i32, i32
  }
  func.func @transform_3(%arg0: i32, %arg1: i32) -> (i32, i32) {
    %c0_i32 = arith.constant 0 : i32
    return %arg0, %arg1 : i32, i32
  }
}

module attributes {stable_mosaic.version = 11 : i64} {
  func.func @_mm1_kernel(%arg0: i32, %arg1: i32, %arg2: memref<256x8xbf16, #tpu.memory_space<vmem>>, %arg3: memref<8x6xbf16, #tpu.memory_space<vmem>>, %arg4: memref<1x6xf32, #tpu.memory_space<vmem>>, %arg5: memref<256x6xf32, #tpu.memory_space<vmem>>) attributes {dimension_semantics = [#tpu.dimension_semantics<parallel>, #tpu.dimension_semantics<parallel>], iteration_bounds = array<i64: 2, 1>, scalar_prefetch = 0 : i64, scratch_operands = 0 : i64, tpu.core_type = #tpu.core_type<tc>, window_params = [{transform_indices = @transform_0, window_bounds = array<i64: 256, 8>}, {transform_indices = @transform_1, window_bounds = array<i64: 8, 6>}, {transform_indices = @transform_2, window_bounds = array<i64: 1, 6>}, {transform_indices = @transform_3, window_bounds = array<i64: 256, 6>}]} {
    %c0 = arith.constant 0 : index
    %c0_0 = arith.constant 0 : index
    %0 = vector.load %arg2[%c0, %c0_0] : memref<256x8xbf16, #tpu.memory_space<vmem>>, vector<256x8xbf16>
    %c0_1 = arith.constant 0 : index
    %c0_2 = arith.constant 0 : index
    %1 = vector.load %arg3[%c0_1, %c0_2] : memref<8x6xbf16, #tpu.memory_space<vmem>>, vector<8x6xbf16>
    %cst = arith.constant dense<0.000000e+00> : vector<256x6xf32>
    %2 = tpu.matmul %0, %1, %cst {dimension_numbers = #tpu.dot_dimension_numbers<[1], [0], [0], [1], [0, 0, 1, 1], [], []>} : vector<256x8xbf16>, vector<8x6xbf16>, vector<256x6xf32> -> vector<256x6xf32>
    %c0_3 = arith.constant 0 : index
    %c0_4 = arith.constant 0 : index
    %3 = vector.load %arg4[%c0_3, %c0_4] : memref<1x6xf32, #tpu.memory_space<vmem>>, vector<1x6xf32>
    %4 = vector.broadcast %3 : vector<1x6xf32> to vector<256x6xf32>
    %5 = arith.addf %2, %4 : vector<256x6xf32>
    %c0_5 = arith.constant 0 : index
    %c0_6 = arith.constant 0 : index
    %6 = vector.load %arg5[%c0_5, %c0_6] : memref<256x6xf32, #tpu.memory_space<vmem>>, vector<256x6xf32>
    tpu.vector_store %arg5[%c0_5, %c0_6], %5 {strides = array<i32>} : memref<256x6xf32, #tpu.memory_space<vmem>>, vector<256x6xf32>,
    return
  }
  func.func @transform_0(%arg0: i32, %arg1: i32) -> (i32, i32) {
    %c0_i32 = arith.constant 0 : i32
    %c0_i32_0 = arith.constant 0 : i32
    return %arg0, %c0_i32 : i32, i32
  }
  func.func @transform_1(%arg0: i32, %arg1: i32) -> (i32, i32) {
    %c0_i32 = arith.constant 0 : i32
    %c0_i32_0 = arith.constant 0 : i32
    return %c0_i32, %arg1 : i32, i32
  }
  func.func @transform_2(%arg0: i32, %arg1: i32) -> (i32, i32) {
    %c0_i32 = arith.constant 0 : i32
    %c0_i32_0 = arith.constant 0 : i32
    return %c0_i32, %arg1 : i32, i32
  }
  func.func @transform_3(%arg0: i32, %arg1: i32) -> (i32, i32) {
    %c0_i32 = arith.constant 0 : i32
    return %arg0, %arg1 : i32, i32
  }
}

</mosaic_0001>

<bundles_post_ra>
// kernel: wavemix_segmentation_forward.9
= control target key start
LH: loop header
LB: loop body
LE: loop exit
PB: predicated region body
PF: predicated region fallthrough
CT: control target
= control target key end

     0   :  { %vm118_vm0 = vcmask 1044480   ;;  %vm119_vm1 = vcmask 1045504   ;;  %v403_v1 = vmov 65535   ;;  %vm93_vm2 = vcmask 220160   ;;  %s529_s1 = inlined_call_operand.vmem [shape: bf16[27,16], index: 1, kind: input, shape index: {}]   ;;  %s530_s0 = inlined_call_operand.vmem [shape: bf16[128,27], index: 0, kind: input, shape index: {}]   ;;  %s531_s2 = inlined_call_operand.vmem [shape: f32[1,16], index: 2, kind: input, shape index: {}]   ;;  %s532_s3 = inlined_call_operand.vmem [shape: bf16[128,16], index: 3, kind: output, shape index: {}]  }
   0x1   :  { %v393_v0 = vld [vmem:[%s529_s1 + $0x8] sm:$0x3f]   ;;  %v120_v2 = vsel %vm118_vm0, 4294967295, %v403_v1  ;;  %v395_v4 = vld [vmem:[%s530_s0] sm:$0xff]   ;;  %v399_v10 = vld [vmem:[%s530_s0 + $0x10] sm:$0xff]   ;;  %vm286_vm3 = vcmask 125952  }
   0x2   :  { %v121_v3 = vsel %vm119_vm1, %v120_v2, 0  ;;  %v394_v6 = vld [vmem:[%s529_s1] sm:$0xff]   ;;  %372 = vmatprep.mubr.msk.bf16.mxu0 %vm93_vm2, %v395_v4  ;;  %v397_v8 = vld [vmem:[%s530_s0 + $0x8] sm:$0xff]   ;;  %v400_v11 = vld [vmem:[%s530_s0 + $0x30] sm:$0xff]  }
   0x3   :  { %v123_v5 = vand.u32 %v393_v0, %v121_v3  ;;  %v396_v7 = vld [vmem:[%s530_s0 + $0x20] sm:$0xff]   ;;  %v398_v9 = vld [vmem:[%s530_s0 + $0x28] sm:$0xff]   ;;  %v401_v12 = vld [vmem:[%s530_s0 + $0x18] sm:$0xff]  }
   0x4   :  { %380 = vmatprep.mubr.msk.bf16.mxu1 %vm93_vm2, %v396_v7  ;;  %v402_v13 = vld [vmem:[%s530_s0 + $0x38] sm:$0xff]   ;;  %v307_v14 = vld [vmem:[%s531_s2] ss:$0 sm:$0xff] }
   0x5   :  { %368 = vmatprep.subr.bf16.mxu0 %v123_v5  ;;  %388 = vmatprep.subr.bf16.mxu1 %v123_v5 }
   0x6   :  { %369 = vmatpush3.bf16.msra.mxu0 %v123_v5  ;;  %390 = vmatpush3.bf16.msra.mxu1 %v123_v5 }
   0x7   :  { %370 = vmatprep.subr.bf16.mxu0 %v394_v6  ;;  %389 = vmatprep.subr.bf16.mxu1 %v394_v6 }
   0xa   :  { %371 = vmatpush3.bf16.msra.mxu0 %v394_v6  ;;  %391 = vmatpush3.bf16.msra.mxu1 %v394_v6 }
   0xd   :  { %373 = vmatmul.mubr.msk.bf16.vlgmr.msra.gmra.mxu0 %vm93_vm2, %v397_v8  ;;  %381 = vmatmul.mubr.msk.bf16.vlgmr.msra.gmra.mxu1 %vm93_vm2, %v398_v9 }
   0xe   :  { %376 = vmatprep.mubr.msk.bf16.mxu0 %vm93_vm2, %v399_v10  ;;  %384 = vmatprep.mubr.msk.bf16.mxu1 %vm93_vm2, %v400_v11 }
  0x15   :  { %377 = vmatmul.mubr.msk.bf16.gmra.mxu0 %vm93_vm2, %v401_v12  ;;  %385 = vmatmul.mubr.msk.bf16.gmra.mxu1 %vm93_vm2, %v402_v13 }
  0xcd   :  { %v374_v15 = vpop.f32.mrf.mxu0  ;;  %v382_v16 = vpop.f32.mrf.mxu1 }
  0xce   :  { %v168_v17 = vadd.f32 %v374_v15, %v307_v14  ;;  %v200_v18 = vadd.f32 %v382_v16, %v307_v14 }
  0xcf   :  { %v159_v19 = vpop.f32.mrf.mxu0  ;;  %v191_v20 = vpop.f32.mrf.mxu1 }
  0xd0   :  { %v344_v21 = vpack.c.bf16 %v168_v17, %v168_v17  ;;  %v352_v22 = vpack.c.bf16 %v200_v18, %v200_v18  ;;  %v160_v23 = vadd.f32 %v307_v14, %v159_v19  ;;  %v192_v24 = vadd.f32 %v307_v14, %v191_v20 }
  0xd1   :  { %v375_v25 = vpop.f32.mrf.mxu0  ;;  %v383_v26 = vpop.f32.mrf.mxu1 }
  0xd2   :  { %289 = vst.msk [vmem:[%s532_s3 + $0x8] sm:$0xf] %vm286_vm3, %v344_v21  ;;  %297 = vst.msk [vmem:[%s532_s3 + $0x28] sm:$0xf] %vm286_vm3, %v352_v22  ;;  %v342_v27 = vpack.c.bf16 %v160_v23, %v160_v23  ;;  %v350_v28 = vpack.c.bf16 %v192_v24, %v192_v24  ;;  %v171_v29 = vadd.f32 %v375_v25, %v307_v14 }
  0xd3   :  { %v203_v30 = vadd.f32 %v383_v26, %v307_v14  ;;  %v162_v31 = vpop.f32.mrf.mxu0  ;;  %v194_v32 = vpop.f32.mrf.mxu1 }
  0xd4   :  { %287 = vst.msk [vmem:[%s532_s3] sm:$0xf] %vm286_vm3, %v342_v27  ;;  %295 = vst.msk [vmem:[%s532_s3 + $0x20] sm:$0xf] %vm286_vm3, %v350_v28  ;;  %v345_v33 = vpack.c.bf16 %v171_v29, %v171_v29  ;;  %v163_v35 = vadd.f32 %v307_v14, %v162_v31  ;;  %v195_v36 = vadd.f32 %v307_v14, %v194_v32 }
  0xd5   :  { %v353_v34 = vpack.c.bf16 %v203_v30, %v203_v30  ;;  %v378_v37 = vpop.f32.mrf.mxu0  ;;  %v386_v38 = vpop.f32.mrf.mxu1 }
  0xd6   :  { %290 = vst.msk [vmem:[%s532_s3 + $0xc] sm:$0xf] %vm286_vm3, %v345_v33  ;;  %v343_v39 = vpack.c.bf16 %v163_v35, %v163_v35  ;;  %v351_v40 = vpack.c.bf16 %v195_v36, %v195_v36  ;;  %v184_v41 = vadd.f32 %v378_v37, %v307_v14  ;;  %v216_v42 = vadd.f32 %v386_v38, %v307_v14 }
  0xd7   :  { %298 = vst.msk [vmem:[%s532_s3 + $0x2c] sm:$0xf] %vm286_vm3, %v353_v34  ;;  %v175_v43 = vpop.f32.mrf.mxu0  ;;  %v207_v44 = vpop.f32.mrf.mxu1 }
  0xd8   :  { %288 = vst.msk [vmem:[%s532_s3 + $0x4] sm:$0xf] %vm286_vm3, %v343_v39  ;;  %296 = vst.msk [vmem:[%s532_s3 + $0x24] sm:$0xf] %vm286_vm3, %v351_v40  ;;  %v348_v45 = vpack.c.bf16 %v184_v41, %v184_v41  ;;  %v356_v46 = vpack.c.bf16 %v216_v42, %v216_v42  ;;  %v176_v47 = vadd.f32 %v307_v14, %v175_v43 }
  0xd9   :  { %v208_v48 = vadd.f32 %v307_v14, %v207_v44  ;;  %v379_v49 = vpop.f32.mrf.mxu0  ;;  %v387_v50 = vpop.f32.mrf.mxu1 }
  0xda   :  { %293 = vst.msk [vmem:[%s532_s3 + $0x18] sm:$0xf] %vm286_vm3, %v348_v45  ;;  %301 = vst.msk [vmem:[%s532_s3 + $0x38] sm:$0xf] %vm286_vm3, %v356_v46  ;;  %v346_v51 = vpack.c.bf16 %v176_v47, %v176_v47  ;;  %v187_v53 = vadd.f32 %v379_v49, %v307_v14  ;;  %v219_v54 = vadd.f32 %v387_v50, %v307_v14 }
  0xdb   :  { %v354_v52 = vpack.c.bf16 %v208_v48, %v208_v48  ;;  %v178_v55 = vpop.f32.mrf.mxu0  ;;  %v210_v56 = vpop.f32.mrf.mxu1 }
  0xdc   :  { %291 = vst.msk [vmem:[%s532_s3 + $0x10] sm:$0xf] %vm286_vm3, %v346_v51  ;;  %v349_v57 = vpack.c.bf16 %v187_v53, %v187_v53  ;;  %v357_v58 = vpack.c.bf16 %v219_v54, %v219_v54  ;;  %v179_v59 = vadd.f32 %v307_v14, %v178_v55  ;;  %v211_v60 = vadd.f32 %v307_v14, %v210_v56 }
  0xdd   :  { %299 = vst.msk [vmem:[%s532_s3 + $0x30] sm:$0xf] %vm286_vm3, %v354_v52 }
  0xde   :  { %294 = vst.msk [vmem:[%s532_s3 + $0x1c] sm:$0xf] %vm286_vm3, %v349_v57  ;;  %302 = vst.msk [vmem:[%s532_s3 + $0x3c] sm:$0xf] %vm286_vm3, %v357_v58  ;;  %v347_v61 = vpack.c.bf16 %v179_v59, %v179_v59  ;;  %v355_v62 = vpack.c.bf16 %v211_v60, %v211_v60 }
  0xe0   :  { %292 = vst.msk [vmem:[%s532_s3 + $0x14] sm:$0xf] %vm286_vm3, %v347_v61  ;;  %300 = vst.msk [vmem:[%s532_s3 + $0x34] sm:$0xf] %vm286_vm3, %v355_v62 }

// kernel: wavemix_segmentation_forward.10
= control target key start
LH: loop header
LB: loop body
LE: loop exit
PB: predicated region body
PF: predicated region fallthrough
CT: control target
= control target key end

     0   :  { %v255_v0 = vmov 0   ;;  %vm116_vm0 = vcmask 130048   ;;  %vm188_vm1 = vcmask 257024   ;;  %s334_s1 = inlined_call_operand.vmem [shape: bf16[144,32], index: 1, kind: input, shape index: {}]   ;;  %s335_s0 = inlined_call_operand.vmem [shape: bf16[32,144], index: 0, kind: input, shape index: {}]   ;;  %s336_s2 = inlined_call_operand.vmem [shape: f32[1,32], index: 2, kind: input, shape index: {}]   ;;  %s337_s3 = inlined_call_operand.vmem [shape: bf16[32,32], index: 3, kind: output, shape index: {}]  }
   0x1   :  { %123 = vmatprep.subr.bf16.mxu0 %v255_v0  ;;  %221 = vmatprep.subr.bf16.mxu1 %v255_v0  ;;  %v240_v1 = vld [vmem:[%s334_s1 + $0x38] sm:$0xff]   ;;  %v241_v2 = vld [vmem:[%s334_s1 + $0x30] sm:$0xff]   ;;  %v242_v3 = vld [vmem:[%s334_s1 + $0x28] sm:$0xff]  }
   0x2   :  { %124 = vmatpush1.bf16.msra.mxu0 %v240_v1  ;;  %230 = vmatpush1.bf16.msra.mxu1 %v240_v1  ;;  %v243_v4 = vld [vmem:[%s334_s1 + $0x20] sm:$0xff]   ;;  %v254_v6 = vld [vmem:[%s335_s0 + $0x14] ss:$8 sps:$4 sm:$0xff]   ;;  %v246_v9 = vld [vmem:[%s334_s1 + $0x8] sm:$0xff]  }
   0x3   :  { %125 = vmatprep.subr.bf16.mxu0 %v255_v0  ;;  %222 = vmatprep.subr.bf16.mxu1 %v255_v0  ;;  %v251_v5 = vld [vmem:[%s335_s0 + $0x4] ss:$8 sps:$4 sm:$0xff]   ;;  %v244_v7 = vld [vmem:[%s334_s1 + $0x18] sm:$0xff]   ;;  %v245_v8 = vld [vmem:[%s334_s1 + $0x10] sm:$0xff]  }
   0x4   :  { %211 = vmatprep.mubr.msk.bf16.mxu0 %vm116_vm0, %v251_v5  ;;  %212 = vmatprep.mubr.msk.bf16.mxu1 %vm116_vm0, %v254_v6  ;;  %v247_v10 = vld [vmem:[%s334_s1] sm:$0xff]   ;;  %v252_v13 = vld [vmem:[%s335_s0 + $0x10] ss:$8 sps:$4 sm:$0xff]  }
   0x5   :  { %v248_v11 = vld [vmem:[%s334_s1 + $0x40] sm:$0xff]  }
   0x6   :  { %126 = vmatpush1.bf16.msra.mxu0 %v241_v2  ;;  %231 = vmatpush1.bf16.msra.mxu1 %v241_v2  ;;  %v249_v12 = vld [vmem:[%s335_s0] ss:$8 sps:$4 sm:$0xff]  }
   0x7   :  { %127 = vmatprep.subr.bf16.mxu0 %v255_v0  ;;  %223 = vmatprep.subr.bf16.mxu1 %v255_v0  ;;  %v197_v14 = vld [vmem:[%s336_s2] ss:$0 sm:$0xff] }
   0xa   :  { %128 = vmatpush1.bf16.msra.mxu0 %v242_v3  ;;  %232 = vmatpush1.bf16.msra.mxu1 %v242_v3 }
   0xb   :  { %129 = vmatprep.subr.bf16.mxu0 %v255_v0  ;;  %224 = vmatprep.subr.bf16.mxu1 %v255_v0 }
   0xe   :  { %130 = vmatpush1.bf16.msra.mxu0 %v243_v4  ;;  %233 = vmatpush1.bf16.msra.mxu1 %v243_v4 }
   0xf   :  { %131 = vmatprep.subr.bf16.mxu0 %v255_v0  ;;  %225 = vmatprep.subr.bf16.mxu1 %v255_v0 }
  0x12   :  { %132 = vmatpush1.bf16.msra.mxu0 %v244_v7  ;;  %234 = vmatpush1.bf16.msra.mxu1 %v244_v7 }
  0x13   :  { %133 = vmatprep.subr.bf16.mxu0 %v255_v0  ;;  %226 = vmatprep.subr.bf16.mxu1 %v255_v0 }
  0x16   :  { %134 = vmatpush1.bf16.msra.mxu0 %v245_v8  ;;  %235 = vmatpush1.bf16.msra.mxu1 %v245_v8 }
  0x17   :  { %135 = vmatprep.subr.bf16.mxu0 %v255_v0  ;;  %227 = vmatprep.subr.bf16.mxu1 %v255_v0 }
  0x1a   :  { %136 = vmatpush1.bf16.msra.mxu0 %v246_v9  ;;  %236 = vmatpush1.bf16.msra.mxu1 %v246_v9 }
  0x1b   :  { %137 = vmatprep.subr.bf16.mxu0 %v255_v0  ;;  %228 = vmatprep.subr.bf16.mxu1 %v255_v0 }
  0x1e   :  { %138 = vmatpush1.bf16.msra.mxu0 %v247_v10  ;;  %237 = vmatpush1.bf16.msra.mxu1 %v247_v10 }
  0x1f   :  { %153 = vmatprep.subr.bf16.mxu0 %v255_v0  ;;  %229 = vmatprep.subr.bf16.mxu1 %v255_v0 }
  0x22   :  { %154 = vmatpush2.bf16.msra.mxu0 %v248_v11  ;;  %238 = vmatpush2.bf16.msra.mxu1 %v248_v11 }
  0x25   :  { %156 = vmatmul.mubr.bf16.vlgmr.msra.gmra.mxu0 %v249_v12  ;;  %164 = vmatmul.mubr.bf16.vlgmr.msra.gmra.mxu1 %v252_v13 }
  0xe5   :  { %v157_v15 = vpop.f32.mrf.mxu0  ;;  %v165_v16 = vpop.f32.mrf.mxu1 }
  0xe6   :  { %v158_v17 = vadd.f32 %v197_v14, %v157_v15  ;;  %v166_v18 = vadd.f32 %v197_v14, %v165_v16 }
  0xe7   :  { %v159_v19 = vpop.f32.mrf.mxu0  ;;  %v167_v20 = vpop.f32.mrf.mxu1 }
  0xe8   :  { %v217_v21 = vpack.c.bf16 %v158_v17, %v158_v17  ;;  %v219_v22 = vpack.c.bf16 %v166_v18, %v166_v18 }
  0xe9   :  { %v160_v23 = vpop.f32.mrf.mxu0  ;;  %v168_v24 = vpop.f32.mrf.mxu1 }
  0xea   :  { %189 = vst.msk [vmem:[%s337_s3] sm:$0xf] %vm188_vm1, %v217_v21  ;;  %191 = vst.msk [vmem:[%s337_s3 + $0x8] sm:$0xf] %vm188_vm1, %v219_v22  ;;  %v161_v25 = vadd.f32 %v197_v14, %v160_v23  ;;  %v169_v26 = vadd.f32 %v197_v14, %v168_v24 }
  0xeb   :  { %v162_v27 = vpop.f32.mrf.mxu0  ;;  %v170_v28 = vpop.f32.mrf.mxu1 }
  0xec   :  { %v218_v29 = vpack.c.bf16 %v161_v25, %v161_v25  ;;  %v220_v30 = vpack.c.bf16 %v169_v26, %v169_v26 }
  0xee   :  { %190 = vst.msk [vmem:[%s337_s3 + $0x4] sm:$0xf] %vm188_vm1, %v218_v29  ;;  %192 = vst.msk [vmem:[%s337_s3 + $0xc] sm:$0xf] %vm188_vm1, %v220_v30 }

// kernel: wavemix_segmentation_forward.12
= control target key start
LH: loop header
LB: loop body
LE: loop exit
PB: predicated region body
PF: predicated region fallthrough
CT: control target
= control target key end

     0   :  { %v370_v1 = vmov 0.0   ;;  %vm371_vm0 = vmmov 0   ;;  %vm184_vm1 = vcmask 261120   ;;  %s477_s1 = inlined_call_operand.vmem [shape: bf16[288,128], index: 1, kind: input, shape index: {}]   ;;  %s478_s0 = inlined_call_operand.vmem [shape: bf16[8,288], index: 0, kind: input, shape index: {}]   ;;  %s479_s2 = inlined_call_operand.vmem [shape: f32[1,128], index: 2, kind: input, shape index: {}]   ;;  %s480_s3 = inlined_call_operand.vmem [shape: f32[2,128], index: 3, kind: input, shape index: {}]   ;;  %s481_s4 = inlined_call_operand.vmem [shape: bf16[8,128], index: 4, kind: input, shape index: {}]   ;;  %s482_s5 = inlined_call_operand.vmem [shape: bf16[8,128], index: 5, kind: output, shape index: {}]  }
   0x1   :  { %v349_v0 = vld [vmem:[%s477_s1 + $0x78] sm:$0xff]   ;;  %339 = vmatprep.subr.bf16.mxu1 %v370_v1  ;;  %343 = vmatprep.mubr.msk.bf16.mxu1 %vm371_vm0, %v370_v1  ;;  %v351_v3 = vld [vmem:[%s477_s1 + $0x70] sm:$0xff]   ;;  %v353_v5 = vld [vmem:[%s477_s1 + $0x68] sm:$0xff]  }
   0x2   :  { %v350_v2 = vld [vmem:[%s477_s1 + $0x38] sm:$0xff]   ;;  %314 = vmatprep.subr.bf16.mxu0 %v349_v0  ;;  %v352_v4 = vld [vmem:[%s477_s1 + $0x30] sm:$0xff]   ;;  %v354_v6 = vld [vmem:[%s477_s1 + $0x28] sm:$0xff]  }
   0x3   :  { %315 = vmatpush3.bf16.msra.mxu0 %v350_v2  ;;  %v355_v7 = vld [vmem:[%s477_s1 + $0x60] sm:$0xff]   ;;  %v357_v9 = vld [vmem:[%s477_s1 + $0x58] sm:$0xff]   ;;  %v363_v10 = vld [vmem:[%s477_s1 + $0x88] sm:$0xff]  }
   0x4   :  { %316 = vmatprep.subr.bf16.mxu0 %v351_v3  ;;  %v356_v8 = vld [vmem:[%s477_s1 + $0x20] sm:$0xff]   ;;  %v358_v11 = vld [vmem:[%s477_s1 + $0x18] sm:$0xff]   ;;  %v359_v12 = vld [vmem:[%s477_s1 + $0x50] sm:$0xff]   ;;  %340 = vmatpush3.bf16.msra.mxu1 %v363_v10 }
   0x5   :  { %341 = vmatprep.subr.bf16.mxu1 %v370_v1  ;;  %v366_v13 = vld [vmem:[%s477_s1 + $0x80] sm:$0xff]   ;;  %v360_v15 = vld [vmem:[%s477_s1 + $0x10] sm:$0xff]   ;;  %v369_v17 = vld [vmem:[%s478_s0 + $0x8] ss:$0 sps:$4 sm:$0xff]  }
   0x6   :  { %v21_v14 = vld [vmem:[%s478_s0] sm:$0xff]  ;;  %v361_v18 = vld [vmem:[%s477_s1 + $0x48] sm:$0xff]  }
   0x7   :  { %317 = vmatpush3.bf16.msra.mxu0 %v352_v4  ;;  %v291_v16 = vcombine.high %v21_v14, %v21_v14  ;;  %v362_v19 = vld [vmem:[%s477_s1 + $0x8] sm:$0xff]   ;;  %v364_v20 = vld [vmem:[%s477_s1 + $0x40] sm:$0xff]   ;;  %v290_v22 = vcombine.low %v21_v14, %v21_v14 }
   0x8   :  { %318 = vmatprep.subr.bf16.mxu0 %v353_v5  ;;  %342 = vmatpush3.bf16.msra.mxu1 %v366_v13  ;;  %v365_v21 = vld [vmem:[%s477_s1] sm:$0xff]  }
   0x9   :  { %220 = vmatprep.mubr.bf16.mxu0 %v291_v16  ;;  %v289_v28 = vld [vmem:[%s479_s2] ss:$0 sm:$0xff]  ;;  %v313_v37 = vld [vmem:[%s480_s3 + $0x1] ss:$0 sm:$0xff] }
   0xa   :  { %v312_v33 = vld [vmem:[%s480_s3] ss:$0 sm:$0xff] }
   0xb   :  { %319 = vmatpush3.bf16.msra.mxu0 %v354_v6  ;;  %344 = vmatmul.mubr.msk.bf16.vlgmr.msra.gmra.mxu1 %vm184_vm1, %v369_v17  ;;  %v280_v34 = vld [vmem:[%s481_s4] sm:$0xf] }
   0xc   :  { %320 = vmatprep.subr.bf16.mxu0 %v355_v7  ;;  %v281_v39 = vunpack.c.l.bf16 %v280_v34 }
   0xf   :  { %321 = vmatpush3.bf16.msra.mxu0 %v356_v8 }
  0x10   :  { %322 = vmatprep.subr.bf16.mxu0 %v357_v9 }
  0x13   :  { %323 = vmatpush3.bf16.msra.mxu0 %v358_v11 }
  0x14   :  { %324 = vmatprep.subr.bf16.mxu0 %v359_v12 }
  0x17   :  { %325 = vmatpush3.bf16.msra.mxu0 %v360_v15 }
  0x18   :  { %326 = vmatprep.subr.bf16.mxu0 %v361_v18 }
  0x1b   :  { %327 = vmatpush3.bf16.msra.mxu0 %v362_v19 }
  0x1c   :  { %328 = vmatprep.subr.bf16.mxu0 %v364_v20 }
  0x1f   :  { %329 = vmatpush3.bf16.msra.mxu0 %v365_v21 }
  0x22   :  { %221 = vmatmul.mubr.bf16.vlgmr.msra.gmra.mxu0 %v290_v22 }
  0xcb   :  { %v262_v23 = vpop.f32.mrf.mxu1 }
  0xcd   :  { %v345_v24 = vpop.f32.mrf.mxu1 }
  0xcf   :  { %v265_v25 = vpop.f32.mrf.mxu1 }
  0xd1   :  { %v346_v26 = vpop.f32.mrf.mxu1 }
  0xe2   :  { %v330_v27 = vpop.f32.mrf.mxu0 }
  0xe4   :  { %v331_v29 = vpop.f32.mrf.mxu0 }
  0xe5   :  { %v332_v30 = vadd.f32 %v331_v29, %v330_v27 }
  0xe6   :  { %v333_v31 = vpop.f32.mrf.mxu0 }
  0xe7   :  { %v223_v32 = vadd.f32 %v332_v30, %v289_v28 }
  0xe8   :  { %v334_v35 = vpop.f32.mrf.mxu0 }
  0xe9   :  { %v263_v36 = vadd.f32 %v262_v23, %v223_v32 }
  0xeb   :  { %v273_v38 = vmul.f32 %v312_v33, %v263_v36 }
  0xed   :  { %v279_v40 = vadd.f32 %v313_v37, %v273_v38 }
  0xef   :  { %v282_v41 = vadd.f32 %v281_v39, %v279_v40 }
  0xf1   :  { %v283_v42 = vpack.c.bf16 %v282_v41, %v282_v41 }
  0xf3   :  { %284 = vst [vmem:[%s482_s5] sm:$0xf] %v283_v42 }

// kernel: wavemix_segmentation_forward.11
= control target key start
LH: loop header
LB: loop body
LE: loop exit
PB: predicated region body
PF: predicated region fallthrough
CT: control target
= control target key end

     0   :  { %v310_v0 = vmov 0.0   ;;  %vm311_vm0 = vmmov 0   ;;  %vm182_vm1 = vcmask 523264   ;;  %vm227_vm2 = vcmask 257024   ;;  %s390_s1 = inlined_call_operand.vmem [shape: bf16[128,64], index: 1, kind: input, shape index: {}]   ;;  %s391_s0 = inlined_call_operand.vmem [shape: bf16[8,128], index: 0, kind: input, shape index: {}]   ;;  %s392_s3 = inlined_call_operand.vmem [shape: bf16[64,32], index: 3, kind: input, shape index: {}]   ;;  %s393_s2 = inlined_call_operand.vmem [shape: f32[1,64], index: 2, kind: input, shape index: {}]   ;;  %s394_s4 = inlined_call_operand.vmem [shape: f32[1,32], index: 4, kind: input, shape index: {}]   ;;  %s395_s5 = inlined_call_operand.vmem [shape: bf16[8,32], index: 5, kind: output, shape index: {}]  }
   0x1   :  { %262 = vmatprep.subr.bf16.mxu0 %v310_v0  ;;  %v296_v1 = vld [vmem:[%s390_s1 + $0x38] sm:$0xff]   ;;  %278 = vmatprep.mubr.msk.bf16.mxu0 %vm311_vm0, %v310_v0  ;;  %v297_v2 = vld [vmem:[%s390_s1 + $0x30] sm:$0xff]   ;;  %v298_v3 = vld [vmem:[%s390_s1 + $0x28] sm:$0xff]  }
   0x2   :  { %282 = vmatprep.subr.bf16.mxu1 %v310_v0  ;;  %290 = vmatprep.mubr.msk.bf16.mxu1 %vm311_vm0, %v310_v0  ;;  %v299_v4 = vld [vmem:[%s390_s1 + $0x20] sm:$0xff]   ;;  %v300_v5 = vld [vmem:[%s390_s1 + $0x18] sm:$0xff]   ;;  %v301_v6 = vld [vmem:[%s390_s1 + $0x10] sm:$0xff]  }
   0x3   :  { %263 = vmatpush3.bf16.msra.mxu0 %v296_v1  ;;  %v302_v7 = vld [vmem:[%s390_s1 + $0x8] sm:$0xff]   ;;  %v303_v8 = vld [vmem:[%s390_s1] sm:$0xff]   ;;  %v304_v10 = vld [vmem:[%s392_s3 + $0x18] sm:$0xff]  }
   0x4   :  { %264 = vmatprep.subr.bf16.mxu0 %v310_v0  ;;  %v21_v9 = vld [vmem:[%s391_s0] sm:$0xf]  ;;  %283 = vmatpush3.bf16.msra.mxu1 %v304_v10  ;;  %v305_v11 = vld [vmem:[%s392_s3 + $0x10] sm:$0xff]   ;;  %v306_v12 = vld [vmem:[%s392_s3 + $0x8] sm:$0xff]  }
   0x5   :  { %284 = vmatprep.subr.bf16.mxu1 %v310_v0  ;;  %v307_v13 = vld [vmem:[%s392_s3] sm:$0xff]  }
   0x6   :  { %v233_v14 = vld [vmem:[%s393_s2] ss:$0 sm:$0xff] }
   0x7   :  { %265 = vmatpush3.bf16.msra.mxu0 %v297_v2  ;;  %v242_v30 = vld [vmem:[%s394_s4] ss:$0 sm:$0xff] }
   0x8   :  { %266 = vmatprep.subr.bf16.mxu0 %v310_v0  ;;  %285 = vmatpush3.bf16.msra.mxu1 %v305_v11 }
   0x9   :  { %286 = vmatprep.subr.bf16.mxu1 %v310_v0 }
   0xb   :  { %267 = vmatpush3.bf16.msra.mxu0 %v298_v3 }
   0xc   :  { %268 = vmatprep.subr.bf16.mxu0 %v310_v0  ;;  %287 = vmatpush3.bf16.msra.mxu1 %v306_v12 }
   0xd   :  { %288 = vmatprep.subr.bf16.mxu1 %v310_v0 }
   0xf   :  { %269 = vmatpush3.bf16.msra.mxu0 %v299_v4 }
  0x10   :  { %270 = vmatprep.subr.bf16.mxu0 %v310_v0  ;;  %289 = vmatpush3.bf16.msra.mxu1 %v307_v13 }
  0x13   :  { %271 = vmatpush3.bf16.msra.mxu0 %v300_v5 }
  0x14   :  { %272 = vmatprep.subr.bf16.mxu0 %v310_v0 }
  0x17   :  { %273 = vmatpush3.bf16.msra.mxu0 %v301_v6 }
  0x18   :  { %274 = vmatprep.subr.bf16.mxu0 %v310_v0 }
  0x1b   :  { %275 = vmatpush3.bf16.msra.mxu0 %v302_v7 }
  0x1c   :  { %276 = vmatprep.subr.bf16.mxu0 %v310_v0 }
  0x1f   :  { %277 = vmatpush3.bf16.msra.mxu0 %v303_v8 }
  0x22   :  { %279 = vmatmul.mubr.bf16.vlgmr.msra.gmra.mxu0 %v21_v9 }
  0xe2   :  { %v127_v15 = vpop.f32.mrf.mxu0 }
  0xe3   :  { %v128_v16 = vadd.f32 %v233_v14, %v127_v15 }
  0xe4   :  { %v280_v17 = vpop.f32.mrf.mxu0 }
  0xe5   :  { %v133_v18 = vmul.f32 %v128_v16, %v128_v16 }
  0xe6   :  { %v130_v19 = vpop.f32.mrf.mxu0 }
  0xe7   :  { %v134_v20 = vmul.f32 %v133_v18, %v128_v16 }
  0xe8   :  { %v281_v21 = vpop.f32.mrf.mxu0 }
  0xe9   :  { %v135_v22 = vmul.f32 0.044715, %v134_v20 }
  0xeb   :  { %v136_v23 = vadd.f32 %v135_v22, %v128_v16 }
  0xed   :  { %v137_v24 = vmul.f32 0.7978846, %v136_v23 }
  0xef   :  { %308 = vtanh.f32 %v137_v24 }
  0xfc   :  { %v309_v25 = vpop.eup %308 }
  0xfd   :  { %v139_v26 = vadd.f32 1.0, %v309_v25 }
  0xff   :  { %v140_v27 = vmul.f32 0.5, %v139_v26 }
 0x101   :  { %v141_v28 = vmul.f32 %v140_v27, %v128_v16 }
 0x103   :  { %v142_v29 = vpack.c.bf16 %v141_v28, %v141_v28 }
 0x105   :  { %291 = vmatmul.mubr.msk.bf16.vlgmr.msra.gmra.mxu1 %vm182_vm1, %v142_v29 }
 0x1c5   :  { %v220_v31 = vpop.f32.mrf.mxu1 }
 0x1c6   :  { %v221_v32 = vadd.f32 %v242_v30, %v220_v31 }
 0x1c7   :  { %v292_v33 = vpop.f32.mrf.mxu1 }
 0x1c8   :  { %v226_v34 = vpack.c.bf16 %v221_v32, %v221_v32 }
 0x1c9   :  { %v223_v35 = vpop.f32.mrf.mxu1 }
 0x1ca   :  { %228 = vst.msk [vmem:[%s395_s5] sm:$0xf] %vm227_vm2, %v226_v34 }
 0x1cb   :  { %v293_v36 = vpop.f32.mrf.mxu1 }

// kernel: wavemix_segmentation_forward.15
= control target key start
LH: loop header
LB: loop body
LE: loop exit
PB: predicated region body
PF: predicated region fallthrough
CT: control target
= control target key end

     0   :  { %vm204_vm0 = vcmask 261120   ;;  %vm325_vm1 = vcmask 519168   ;;  %s546_s1 = inlined_call_operand.vmem [shape: bf16[288,64], index: 1, kind: input, shape index: {}]   ;;  %s547_s0 = inlined_call_operand.vmem [shape: bf16[32,288], index: 0, kind: input, shape index: {}]   ;;  %s548_s2 = inlined_call_operand.vmem [shape: f32[1,64], index: 2, kind: input, shape index: {}]   ;;  %s549_s3 = inlined_call_operand.vmem [shape: bf16[32,64], index: 3, kind: output, shape index: {}]  }
   0x1   :  { %v409_v0 = vld [vmem:[%s546_s1 + $0x78] sm:$0xff]   ;;  %v411_v2 = vld [vmem:[%s546_s1 + $0x70] sm:$0xff]   ;;  %v413_v4 = vld [vmem:[%s546_s1 + $0x68] sm:$0xff]  }
   0x2   :  { %v410_v1 = vld [vmem:[%s546_s1 + $0x38] sm:$0xff]   ;;  %369 = vmatprep.subr.bf16.mxu0 %v409_v0  ;;  %v412_v3 = vld [vmem:[%s546_s1 + $0x30] sm:$0xff]   ;;  %v414_v5 = vld [vmem:[%s546_s1 + $0x28] sm:$0xff]  }
   0x3   :  { %370 = vmatpush3.bf16.msra.mxu0 %v410_v1  ;;  %v415_v6 = vld [vmem:[%s546_s1 + $0x60] sm:$0xff]   ;;  %v417_v8 = vld [vmem:[%s546_s1 + $0x58] sm:$0xff]   ;;  %v424_v10 = vld [vmem:[%s546_s1 + $0x88] sm:$0xff]  }
   0x4   :  { %371 = vmatprep.subr.bf16.mxu0 %v411_v2  ;;  %v416_v7 = vld [vmem:[%s546_s1 + $0x20] sm:$0xff]   ;;  %v418_v9 = vld [vmem:[%s546_s1 + $0x18] sm:$0xff]   ;;  %v419_v11 = vld [vmem:[%s546_s1 + $0x50] sm:$0xff]   ;;  %401 = vmatprep.subr.bf16.mxu1 %v424_v10 }
   0x5   :  { %v420_v12 = vld [vmem:[%s546_s1 + $0x10] sm:$0xff]   ;;  %v421_v13 = vld [vmem:[%s546_s1 + $0x48] sm:$0xff]   ;;  %402 = vmatpush3.bf16.msra.mxu1 %v424_v10  ;;  %v429_v15 = vld [vmem:[%s546_s1 + $0x80] sm:$0xff]  }
   0x6   :  { %v428_v14 = vld [vmem:[%s547_s0 + $0x4] ss:$12 sps:$4 sm:$0xff]   ;;  %v430_v16 = vld [vmem:[%s547_s0 + $0x8] ss:$12 sps:$4 sm:$0xff]   ;;  %403 = vmatprep.subr.bf16.mxu1 %v429_v15  ;;  %v431_v17 = vld [vmem:[%s547_s0 + $0x20] ss:$12 sps:$4 sm:$0xff]  }
   0x7   :  { %372 = vmatpush3.bf16.msra.mxu0 %v412_v3  ;;  %243 = vmatprep.mubr.bf16.mxu0 %v428_v14  ;;  %v422_v18 = vld [vmem:[%s546_s1 + $0x8] sm:$0xff]   ;;  %v423_v19 = vld [vmem:[%s546_s1 + $0x40] sm:$0xff]  }
   0x8   :  { %373 = vmatprep.subr.bf16.mxu0 %v413_v4  ;;  %405 = vmatprep.mubr.msk.bf16.mxu1 %vm204_vm0, %v430_v16  ;;  %v425_v20 = vld [vmem:[%s546_s1] sm:$0xff]   ;;  %v432_v22 = vld [vmem:[%s547_s0 + $0x1c] ss:$12 sps:$4 sm:$0xff]  }
   0x9   :  { %404 = vmatpush3.bf16.msra.mxu1 %v429_v15  ;;  %v426_v21 = vld [vmem:[%s547_s0] ss:$12 sps:$4 sm:$0xff]   ;;  %v434_v23 = vld [vmem:[%s547_s0 + $0x18] ss:$12 sps:$4 sm:$0xff]  }
   0xa   :  { %v334_v28 = vld [vmem:[%s548_s2] ss:$0 sm:$0xff] }
   0xb   :  { %374 = vmatpush3.bf16.msra.mxu0 %v414_v5 }
   0xc   :  { %375 = vmatprep.subr.bf16.mxu0 %v415_v6  ;;  %406 = vmatmul.mubr.msk.bf16.vlgmr.msra.gmra.mxu1 %vm204_vm0, %v431_v17 }
   0xf   :  { %376 = vmatpush3.bf16.msra.mxu0 %v416_v7 }
  0x10   :  { %377 = vmatprep.subr.bf16.mxu0 %v417_v8 }
  0x13   :  { %378 = vmatpush3.bf16.msra.mxu0 %v418_v9 }
  0x14   :  { %379 = vmatprep.subr.bf16.mxu0 %v419_v11 }
  0x17   :  { %380 = vmatpush3.bf16.msra.mxu0 %v420_v12 }
  0x18   :  { %381 = vmatprep.subr.bf16.mxu0 %v421_v13 }
  0x1b   :  { %382 = vmatpush3.bf16.msra.mxu0 %v422_v18 }
  0x1c   :  { %383 = vmatprep.subr.bf16.mxu0 %v423_v19 }
  0x1f   :  { %384 = vmatpush3.bf16.msra.mxu0 %v425_v20 }
  0x22   :  { %244 = vmatmul.mubr.bf16.vlgmr.msra.gmra.mxu0 %v426_v21 }
  0x23   :  { %251 = vmatprep.mubr.bf16.mxu0 %v432_v22 }
  0x2a   :  { %252 = vmatmul.mubr.bf16.gmra.mxu0 %v434_v23 }
  0xcc   :  { %v407_v24 = vpop.f32.mrf.mxu1 }
  0xce   :  { %v294_v26 = vpop.f32.mrf.mxu1 }
  0xd0   :  { %v408_v31 = vpop.f32.mrf.mxu1 }
  0xd2   :  { %v297_v37 = vpop.f32.mrf.mxu1 }
  0xe2   :  { %v385_v25 = vpop.f32.mrf.mxu0 }
  0xe4   :  { %v386_v27 = vpop.f32.mrf.mxu0 }
  0xe5   :  { %v387_v29 = vadd.f32 %v386_v27, %v385_v25 }
  0xe6   :  { %v388_v30 = vpop.f32.mrf.mxu0 }
  0xe7   :  { %v246_v32 = vadd.f32 %v387_v29, %v334_v28 }
  0xe8   :  { %v389_v33 = vpop.f32.mrf.mxu0 }
  0xe9   :  { %v390_v34 = vadd.f32 %v389_v33, %v388_v30  ;;  %v295_v35 = vadd.f32 %v294_v26, %v246_v32 }
  0xea   :  { %v391_v36 = vpop.f32.mrf.mxu0 }
  0xeb   :  { %v365_v38 = vpack.c.bf16 %v295_v35, %v295_v35  ;;  %v249_v39 = vadd.f32 %v390_v34, %v334_v28 }
  0xec   :  { %v392_v40 = vpop.f32.mrf.mxu0 }
  0xed   :  { %326 = vst.msk [vmem:[%s549_s3] sm:$0xf] %vm325_vm1, %v365_v38  ;;  %v393_v41 = vadd.f32 %v392_v40, %v391_v36  ;;  %v298_v42 = vadd.f32 %v297_v37, %v249_v39 }
  0xee   :  { %v394_v43 = vpop.f32.mrf.mxu0 }
  0xef   :  { %v254_v44 = vadd.f32 %v393_v41, %v334_v28  ;;  %v366_v45 = vpack.c.bf16 %v298_v42, %v298_v42 }
  0xf0   :  { %v395_v46 = vpop.f32.mrf.mxu0 }
  0xf1   :  { %v303_v47 = vadd.f32 %v407_v24, %v254_v44  ;;  %327 = vst.msk [vmem:[%s549_s3 + $0x4] sm:$0xf] %vm325_vm1, %v366_v45  ;;  %v396_v48 = vadd.f32 %v395_v46, %v394_v43 }
  0xf3   :  { %v367_v49 = vpack.c.bf16 %v303_v47, %v303_v47  ;;  %v257_v50 = vadd.f32 %v396_v48, %v334_v28 }
  0xf5   :  { %328 = vst.msk [vmem:[%s549_s3 + $0x8] sm:$0xf] %vm325_vm1, %v367_v49  ;;  %v306_v51 = vadd.f32 %v408_v31, %v257_v50 }
  0xf7   :  { %v368_v52 = vpack.c.bf16 %v306_v51, %v306_v51 }
  0xf9   :  { %329 = vst.msk [vmem:[%s549_s3 + $0xc] sm:$0xf] %vm325_vm1, %v368_v52 }

// kernel: wavemix_segmentation_forward.16
= control target key start
LH: loop header
LB: loop body
LE: loop exit
PB: predicated region body
PF: predicated region fallthrough
CT: control target
= control target key end

     0   :  { %v507_v0 = vmov 0   ;;  %vm182_vm0 = vcmask 130048   ;;  %vm368_vm1 = vcmask 257024   ;;  %s696_s1 = inlined_call_operand.vmem [shape: bf16[144,32], index: 1, kind: input, shape index: {}]   ;;  %s697_s0 = inlined_call_operand.vmem [shape: bf16[128,144], index: 0, kind: input, shape index: {}]   ;;  %s698_s2 = inlined_call_operand.vmem [shape: f32[1,32], index: 2, kind: input, shape index: {}]   ;;  %s699_s3 = inlined_call_operand.vmem [shape: bf16[128,32], index: 3, kind: output, shape index: {}]  }
   0x1   :  { %207 = vmatprep.subr.bf16.mxu0 %v507_v0  ;;  %455 = vmatprep.subr.bf16.mxu1 %v507_v0  ;;  %v474_v1 = vld [vmem:[%s696_s1 + $0x38] sm:$0xff]   ;;  %v475_v2 = vld [vmem:[%s696_s1 + $0x30] sm:$0xff]   ;;  %v476_v3 = vld [vmem:[%s696_s1 + $0x28] sm:$0xff]  }
   0x2   :  { %208 = vmatpush1.bf16.msra.mxu0 %v474_v1  ;;  %464 = vmatpush1.bf16.msra.mxu1 %v474_v1  ;;  %v477_v4 = vld [vmem:[%s696_s1 + $0x20] sm:$0xff]   ;;  %v478_v7 = vld [vmem:[%s696_s1 + $0x18] sm:$0xff]   ;;  %v479_v8 = vld [vmem:[%s696_s1 + $0x10] sm:$0xff]  }
   0x3   :  { %209 = vmatprep.subr.bf16.mxu0 %v507_v0  ;;  %456 = vmatprep.subr.bf16.mxu1 %v507_v0  ;;  %v485_v5 = vld [vmem:[%s697_s0 + $0x4] ss:$8 sps:$4 sm:$0xff]   ;;  %v483_v12 = vld [vmem:[%s697_s0] ss:$8 sps:$4 sm:$0xff]   ;;  %v489_v14 = vld [vmem:[%s697_s0 + $0x14] ss:$8 sps:$4 sm:$0xff]  }
   0x4   :  { %v488_v6 = vld [vmem:[%s697_s0 + $0x44] ss:$8 sps:$4 sm:$0xff]   ;;  %415 = vmatprep.mubr.msk.bf16.mxu0 %vm182_vm0, %v485_v5  ;;  %v486_v13 = vld [vmem:[%s697_s0 + $0x40] ss:$8 sps:$4 sm:$0xff]   ;;  %v491_v15 = vld [vmem:[%s697_s0 + $0x54] ss:$8 sps:$4 sm:$0xff]  }
   0x5   :  { %419 = vmatprep.mubr.msk.bf16.mxu1 %vm182_vm0, %v488_v6  ;;  %v480_v9 = vld [vmem:[%s696_s1 + $0x8] sm:$0xff]   ;;  %v481_v10 = vld [vmem:[%s696_s1] sm:$0xff]   ;;  %v493_v16 = vld [vmem:[%s697_s0 + $0x10] ss:$8 sps:$4 sm:$0xff]  }
   0x6   :  { %210 = vmatpush1.bf16.msra.mxu0 %v475_v2  ;;  %465 = vmatpush1.bf16.msra.mxu1 %v475_v2  ;;  %v482_v11 = vld [vmem:[%s696_s1 + $0x40] sm:$0xff]   ;;  %v494_v17 = vld [vmem:[%s697_s0 + $0x50] ss:$8 sps:$4 sm:$0xff]   ;;  %v501_v22 = vld [vmem:[%s697_s0 + $0x34] ss:$8 sps:$4 sm:$0xff]  }
   0x7   :  { %211 = vmatprep.subr.bf16.mxu0 %v507_v0  ;;  %457 = vmatprep.subr.bf16.mxu1 %v507_v0  ;;  %v495_v18 = vld [vmem:[%s697_s0 + $0x24] ss:$8 sps:$4 sm:$0xff]   ;;  %v499_v20 = vld [vmem:[%s697_s0 + $0x20] ss:$8 sps:$4 sm:$0xff]   ;;  %v503_v23 = vld [vmem:[%s697_s0 + $0x74] ss:$8 sps:$4 sm:$0xff]  }
   0x8   :  { %v497_v19 = vld [vmem:[%s697_s0 + $0x64] ss:$8 sps:$4 sm:$0xff]   ;;  %v500_v21 = vld [vmem:[%s697_s0 + $0x60] ss:$8 sps:$4 sm:$0xff]   ;;  %v505_v24 = vld [vmem:[%s697_s0 + $0x30] ss:$8 sps:$4 sm:$0xff]  }
   0x9   :  { %v506_v25 = vld [vmem:[%s697_s0 + $0x70] ss:$8 sps:$4 sm:$0xff]   ;;  %v614_v26 = vld [vmem:[%s698_s2] ss:$0 sm:$0xff] }
   0xa   :  { %212 = vmatpush1.bf16.msra.mxu0 %v476_v3  ;;  %466 = vmatpush1.bf16.msra.mxu1 %v476_v3 }
   0xb   :  { %213 = vmatprep.subr.bf16.mxu0 %v507_v0  ;;  %458 = vmatprep.subr.bf16.mxu1 %v507_v0 }
   0xe   :  { %214 = vmatpush1.bf16.msra.mxu0 %v477_v4  ;;  %467 = vmatpush1.bf16.msra.mxu1 %v477_v4 }
   0xf   :  { %215 = vmatprep.subr.bf16.mxu0 %v507_v0  ;;  %459 = vmatprep.subr.bf16.mxu1 %v507_v0 }
  0x12   :  { %216 = vmatpush1.bf16.msra.mxu0 %v478_v7  ;;  %468 = vmatpush1.bf16.msra.mxu1 %v478_v7 }
  0x13   :  { %217 = vmatprep.subr.bf16.mxu0 %v507_v0  ;;  %460 = vmatprep.subr.bf16.mxu1 %v507_v0 }
  0x16   :  { %218 = vmatpush1.bf16.msra.mxu0 %v479_v8  ;;  %469 = vmatpush1.bf16.msra.mxu1 %v479_v8 }
  0x17   :  { %219 = vmatprep.subr.bf16.mxu0 %v507_v0  ;;  %461 = vmatprep.subr.bf16.mxu1 %v507_v0 }
  0x1a   :  { %220 = vmatpush1.bf16.msra.mxu0 %v480_v9  ;;  %470 = vmatpush1.bf16.msra.mxu1 %v480_v9 }
  0x1b   :  { %221 = vmatprep.subr.bf16.mxu0 %v507_v0  ;;  %462 = vmatprep.subr.bf16.mxu1 %v507_v0 }
  0x1e   :  { %222 = vmatpush1.bf16.msra.mxu0 %v481_v10  ;;  %471 = vmatpush1.bf16.msra.mxu1 %v481_v10 }
  0x1f   :  { %237 = vmatprep.subr.bf16.mxu0 %v507_v0  ;;  %463 = vmatprep.subr.bf16.mxu1 %v507_v0 }
  0x22   :  { %238 = vmatpush2.bf16.msra.mxu0 %v482_v11  ;;  %472 = vmatpush2.bf16.msra.mxu1 %v482_v11 }
  0x25   :  { %240 = vmatmul.mubr.bf16.vlgmr.msra.gmra.mxu0 %v483_v12  ;;  %272 = vmatmul.mubr.bf16.vlgmr.msra.gmra.mxu1 %v486_v13 }
  0x26   :  { %416 = vmatprep.mubr.msk.bf16.mxu0 %vm182_vm0, %v489_v14  ;;  %420 = vmatprep.mubr.msk.bf16.mxu1 %vm182_vm0, %v491_v15 }
  0x2d   :  { %248 = vmatmul.mubr.bf16.gmra.mxu0 %v493_v16  ;;  %280 = vmatmul.mubr.bf16.gmra.mxu1 %v494_v17 }
  0x2e   :  { %417 = vmatprep.mubr.msk.bf16.mxu0 %vm182_vm0, %v495_v18  ;;  %421 = vmatprep.mubr.msk.bf16.mxu1 %vm182_vm0, %v497_v19 }
  0x35   :  { %256 = vmatmul.mubr.bf16.gmra.mxu0 %v499_v20  ;;  %288 = vmatmul.mubr.bf16.gmra.mxu1 %v500_v21 }
  0x36   :  { %418 = vmatprep.mubr.msk.bf16.mxu0 %vm182_vm0, %v501_v22  ;;  %422 = vmatprep.mubr.msk.bf16.mxu1 %vm182_vm0, %v503_v23 }
  0x3d   :  { %264 = vmatmul.mubr.bf16.gmra.mxu0 %v505_v24  ;;  %296 = vmatmul.mubr.bf16.gmra.mxu1 %v506_v25 }
  0xe5   :  { %v241_v27 = vpop.f32.mrf.mxu0  ;;  %v273_v28 = vpop.f32.mrf.mxu1 }
  0xe6   :  { %v242_v29 = vadd.f32 %v614_v26, %v241_v27  ;;  %v274_v30 = vadd.f32 %v614_v26, %v273_v28 }
  0xe7   :  { %v243_v31 = vpop.f32.mrf.mxu0  ;;  %v275_v32 = vpop.f32.mrf.mxu1 }
  0xe8   :  { %v439_v33 = vpack.c.bf16 %v242_v29, %v242_v29  ;;  %v447_v34 = vpack.c.bf16 %v274_v30, %v274_v30 }
  0xe9   :  { %v244_v35 = vpop.f32.mrf.mxu0  ;;  %v276_v36 = vpop.f32.mrf.mxu1 }
  0xea   :  { %369 = vst.msk [vmem:[%s699_s3] sm:$0xf] %vm368_vm1, %v439_v33  ;;  %377 = vst.msk [vmem:[%s699_s3 + $0x20] sm:$0xf] %vm368_vm1, %v447_v34  ;;  %v245_v37 = vadd.f32 %v614_v26, %v244_v35  ;;  %v277_v38 = vadd.f32 %v614_v26, %v276_v36 }
  0xeb   :  { %v246_v39 = vpop.f32.mrf.mxu0  ;;  %v278_v40 = vpop.f32.mrf.mxu1 }
  0xec   :  { %v440_v41 = vpack.c.bf16 %v245_v37, %v245_v37  ;;  %v448_v42 = vpack.c.bf16 %v277_v38, %v277_v38 }
  0xed   :  { %v249_v43 = vpop.f32.mrf.mxu0  ;;  %v281_v44 = vpop.f32.mrf.mxu1 }
  0xee   :  { %370 = vst.msk [vmem:[%s699_s3 + $0x4] sm:$0xf] %vm368_vm1, %v440_v41  ;;  %378 = vst.msk [vmem:[%s699_s3 + $0x24] sm:$0xf] %vm368_vm1, %v448_v42  ;;  %v250_v45 = vadd.f32 %v614_v26, %v249_v43  ;;  %v282_v46 = vadd.f32 %v614_v26, %v281_v44 }
  0xef   :  { %v251_v47 = vpop.f32.mrf.mxu0  ;;  %v283_v48 = vpop.f32.mrf.mxu1 }
  0xf0   :  { %v441_v49 = vpack.c.bf16 %v250_v45, %v250_v45  ;;  %v449_v50 = vpack.c.bf16 %v282_v46, %v282_v46 }
  0xf1   :  { %v252_v51 = vpop.f32.mrf.mxu0  ;;  %v284_v52 = vpop.f32.mrf.mxu1 }
  0xf2   :  { %371 = vst.msk [vmem:[%s699_s3 + $0x8] sm:$0xf] %vm368_vm1, %v441_v49  ;;  %379 = vst.msk [vmem:[%s699_s3 + $0x28] sm:$0xf] %vm368_vm1, %v449_v50  ;;  %v253_v53 = vadd.f32 %v614_v26, %v252_v51  ;;  %v285_v54 = vadd.f32 %v614_v26, %v284_v52 }
  0xf3   :  { %v254_v55 = vpop.f32.mrf.mxu0  ;;  %v286_v56 = vpop.f32.mrf.mxu1 }
  0xf4   :  { %v442_v57 = vpack.c.bf16 %v253_v53, %v253_v53  ;;  %v450_v58 = vpack.c.bf16 %v285_v54, %v285_v54 }
  0xf5   :  { %v257_v59 = vpop.f32.mrf.mxu0  ;;  %v289_v60 = vpop.f32.mrf.mxu1 }
  0xf6   :  { %372 = vst.msk [vmem:[%s699_s3 + $0xc] sm:$0xf] %vm368_vm1, %v442_v57  ;;  %380 = vst.msk [vmem:[%s699_s3 + $0x2c] sm:$0xf] %vm368_vm1, %v450_v58  ;;  %v258_v61 = vadd.f32 %v614_v26, %v257_v59  ;;  %v290_v62 = vadd.f32 %v614_v26, %v289_v60 }
  0xf7   :  { %v259_v63 = vpop.f32.mrf.mxu0  ;;  %v291_v0 = vpop.f32.mrf.mxu1 }
  0xf8   :  { %v443_v1 = vpack.c.bf16 %v258_v61, %v258_v61  ;;  %v451_v2 = vpack.c.bf16 %v290_v62, %v290_v62 }
  0xf9   :  { %v260_v3 = vpop.f32.mrf.mxu0  ;;  %v292_v4 = vpop.f32.mrf.mxu1 }
  0xfa   :  { %373 = vst.msk [vmem:[%s699_s3 + $0x10] sm:$0xf] %vm368_vm1, %v443_v1  ;;  %381 = vst.msk [vmem:[%s699_s3 + $0x30] sm:$0xf] %vm368_vm1, %v451_v2  ;;  %v261_v5 = vadd.f32 %v614_v26, %v260_v3  ;;  %v293_v6 = vadd.f32 %v614_v26, %v292_v4 }
  0xfb   :  { %v262_v7 = vpop.f32.mrf.mxu0  ;;  %v294_v8 = vpop.f32.mrf.mxu1 }
  0xfc   :  { %v444_v9 = vpack.c.bf16 %v261_v5, %v261_v5  ;;  %v452_v10 = vpack.c.bf16 %v293_v6, %v293_v6 }
  0xfd   :  { %v265_v11 = vpop.f32.mrf.mxu0  ;;  %v297_v12 = vpop.f32.mrf.mxu1 }
  0xfe   :  { %374 = vst.msk [vmem:[%s699_s3 + $0x14] sm:$0xf] %vm368_vm1, %v444_v9  ;;  %382 = vst.msk [vmem:[%s699_s3 + $0x34] sm:$0xf] %vm368_vm1, %v452_v10  ;;  %v266_v13 = vadd.f32 %v614_v26, %v265_v11  ;;  %v298_v14 = vadd.f32 %v614_v26, %v297_v12 }
  0xff   :  { %v267_v15 = vpop.f32.mrf.mxu0  ;;  %v299_v16 = vpop.f32.mrf.mxu1 }
 0x100   :  { %v445_v17 = vpack.c.bf16 %v266_v13, %v266_v13  ;;  %v453_v18 = vpack.c.bf16 %v298_v14, %v298_v14 }
 0x101   :  { %v268_v19 = vpop.f32.mrf.mxu0  ;;  %v300_v20 = vpop.f32.mrf.mxu1 }
 0x102   :  { %375 = vst.msk [vmem:[%s699_s3 + $0x18] sm:$0xf] %vm368_vm1, %v445_v17  ;;  %383 = vst.msk [vmem:[%s699_s3 + $0x38] sm:$0xf] %vm368_vm1, %v453_v18  ;;  %v269_v21 = vadd.f32 %v614_v26, %v268_v19  ;;  %v301_v22 = vadd.f32 %v614_v26, %v300_v20 }
 0x103   :  { %v270_v23 = vpop.f32.mrf.mxu0  ;;  %v302_v24 = vpop.f32.mrf.mxu1 }
 0x104   :  { %v446_v25 = vpack.c.bf16 %v269_v21, %v269_v21  ;;  %v454_v27 = vpack.c.bf16 %v301_v22, %v301_v22 }
 0x106   :  { %376 = vst.msk [vmem:[%s699_s3 + $0x1c] sm:$0xf] %vm368_vm1, %v446_v25  ;;  %384 = vst.msk [vmem:[%s699_s3 + $0x3c] sm:$0xf] %vm368_vm1, %v454_v27 }

// kernel: wavemix_segmentation_forward.17
= control target key start
LH: loop header
LB: loop body
LE: loop exit
PB: predicated region body
PF: predicated region fallthrough
CT: control target
= control target key end

     0   :  { %s880_s12 = smov 0   ;;  %s882_s13 = smov 0   ;;  %s1057_s0 = inlined_call_operand.vmem [shape: bf16[512,8], index: 0, kind: input, shape index: {}]   ;;  %s1058_s1 = inlined_call_operand.vmem [shape: bf16[8,6], index: 1, kind: input, shape index: {}]   ;;  %s1059_s2 = inlined_call_operand.vmem [shape: f32[1,6], index: 2, kind: input, shape index: {}]   ;;  %s1060_s3 = inlined_call_operand.vmem [shape: f32[512,6], index: 3, kind: output, shape index: {}]  }
   0x1   :  { %s884_s14 = smov 0  }
   0x2 LB: > { %s25_s15 = sadd.s32 1, %s854_s13  ;;  %p701_p0 = scmp.ge.s32.totalorder %s858_s14, 1  ;;  %s858_s14 = sphi %s884_s14, %s13_s14   ;;  %s854_s13 = sphi %s882_s13, %s1062_s13   ;;  %s850_s12 = sphi %s880_s12, %s1061_s12  }
   0x3   : > { %p27_p1 = scmp.ge.s32.totalorder %s25_s15, 2  ;;  %p169_p2 = scmp.lt.s32.totalorder %s858_s14, 3 }
   0x5   : > { %s1064_s15 = smov (%p27_p1, %s25_s15), 0  ;;  %p170_p3 = pnand %p701_p0, %p169_p2 }
   0x6   : > { %s702_s18 = sshll.u32 (!%p170_p3), %s850_s12, 5 }
   0x7   : > { %173 = sbr.rel (%p170_p3) target bundleno = 244 (0xf4), region = 32  ;;  %p204_p4 = scmp.lt.s32.totalorder (!%p170_p3), %s702_s18, 63 }
   0xc   : > { %v258_v0 = vld [vmem:[%s1058_s1] sm:$0xf]  ;;  %vm395_vm0 = vcmask 1043456   ;;  %s1066_s18 = smov (!%p204_p4, %s702_s18), 63  ;;  %vm346_vm1 = vcmask 64512   ;;  %vm560_vm2 = vcmask 48128  }
   0xd   : > { %794 = vmatprep.subr.msk.bf16.mxu0 %vm395_vm0, %v258_v0  ;;  %795 = vmatprep.subr.msk.bf16.mxu1 %vm395_vm0, %v258_v0  ;;  %v397_v1 = vsel %vm395_vm0, %v258_v0, 0  ;;  %s703_s19 = sshll.u32 %s1066_s18, 2  ;;  %s705_s23 = sshll.u32 %s1066_s18, 3  ;;  %v945_v18 = vld [vmem:[%s1059_s2] ss:$0 sm:$0xff] }
   0xe   : > { %759 = vmatpush3.bf16.msra.mxu0 %v397_v1  ;;  %793 = vmatpush3.bf16.msra.mxu1 %v397_v1  ;;  %s907_s22 = scalar_lea.vmem %s1057_s0, %s703_s19  ;;  %s950_s28 = scalar_lea.vmem %s1060_s3, %s705_s23 }
   0xf   : > { %v820_v2 = vld [vmem:[%s907_s22] sm:$0xff]   ;;  %v822_v4 = vld [vmem:[%s907_s22 + $0x8] sm:$0xff]   ;;  %v824_v6 = vld [vmem:[%s907_s22 + $0x10] sm:$0xff]  }
  0x10   : > { %v821_v3 = vld [vmem:[%s907_s22 + $0x40] sm:$0xff]   ;;  %760 = vmatprep.mubr.msk.bf16.mxu0 %vm346_vm1, %v820_v2  ;;  %v823_v5 = vld [vmem:[%s907_s22 + $0x48] sm:$0xff]   ;;  %v825_v7 = vld [vmem:[%s907_s22 + $0x50] sm:$0xff]  }
  0x11   : > { %776 = vmatprep.mubr.msk.bf16.mxu1 %vm346_vm1, %v821_v3  ;;  %761 = vmatmul.mubr.msk.bf16.vlgmr.msra.gmra.mxu0 %vm346_vm1, %v822_v4  ;;  %v826_v8 = vld [vmem:[%s907_s22 + $0x18] sm:$0xff]   ;;  %v828_v10 = vld [vmem:[%s907_s22 + $0x20] sm:$0xff]   ;;  %v830_v12 = vld [vmem:[%s907_s22 + $0x28] sm:$0xff]  }
  0x12   : > { %777 = vmatmul.mubr.msk.bf16.vlgmr.msra.gmra.mxu1 %vm346_vm1, %v823_v5  ;;  %764 = vmatprep.mubr.msk.bf16.mxu0 %vm346_vm1, %v824_v6  ;;  %v827_v9 = vld [vmem:[%s907_s22 + $0x58] sm:$0xff]   ;;  %v829_v11 = vld [vmem:[%s907_s22 + $0x60] sm:$0xff]   ;;  %v831_v13 = vld [vmem:[%s907_s22 + $0x68] sm:$0xff]  }
  0x13   : > { %780 = vmatprep.mubr.msk.bf16.mxu1 %vm346_vm1, %v825_v7  ;;  %v832_v14 = vld [vmem:[%s907_s22 + $0x30] sm:$0xff]   ;;  %v834_v16 = vld [vmem:[%s907_s22 + $0x38] sm:$0xff]  }
  0x14   : > { %v833_v15 = vld [vmem:[%s907_s22 + $0x70] sm:$0xff]   ;;  %v835_v17 = vld [vmem:[%s907_s22 + $0x78] sm:$0xff]  }
  0x19   : > { %765 = vmatmul.mubr.msk.bf16.gmra.mxu0 %vm346_vm1, %v826_v8 }
  0x1a   : > { %781 = vmatmul.mubr.msk.bf16.gmra.mxu1 %vm346_vm1, %v827_v9  ;;  %768 = vmatprep.mubr.msk.bf16.mxu0 %vm346_vm1, %v828_v10 }
  0x1b   : > { %784 = vmatprep.mubr.msk.bf16.mxu1 %vm346_vm1, %v829_v11 }
  0x21   : > { %769 = vmatmul.mubr.msk.bf16.gmra.mxu0 %vm346_vm1, %v830_v12 }
  0x22   : > { %785 = vmatmul.mubr.msk.bf16.gmra.mxu1 %vm346_vm1, %v831_v13  ;;  %772 = vmatprep.mubr.msk.bf16.mxu0 %vm346_vm1, %v832_v14 }
  0x23   : > { %788 = vmatprep.mubr.msk.bf16.mxu1 %vm346_vm1, %v833_v15 }
  0x29   : > { %773 = vmatmul.mubr.msk.bf16.gmra.mxu0 %vm346_vm1, %v834_v16 }
  0x2a   : > { %789 = vmatmul.mubr.msk.bf16.gmra.mxu1 %vm346_vm1, %v835_v17 }
  0xd1   : > { %v762_v19 = vpop.f32.mrf.mxu0 }
  0xd2   : > { %v442_v20 = vadd.f32 %v762_v19, %v945_v18  ;;  %v778_v21 = vpop.f32.mrf.mxu1 }
  0xd3   : > { %v506_v22 = vadd.f32 %v778_v21, %v945_v18  ;;  %v433_v23 = vpop.f32.mrf.mxu0 }
  0xd4   : > { %563 = vst.msk [vmem:[%s950_s28 + $0x10] sm:$0xff] %vm560_vm2, %v442_v20  ;;  %v434_v24 = vadd.f32 %v945_v18, %v433_v23  ;;  %v497_v25 = vpop.f32.mrf.mxu1 }
  0xd5   : > { %579 = vst.msk [vmem:[%s950_s28 + $0x90] sm:$0xff] %vm560_vm2, %v506_v22  ;;  %v498_v26 = vadd.f32 %v945_v18, %v497_v25  ;;  %v763_v27 = vpop.f32.mrf.mxu0 }
  0xd6   : > { %561 = vst.msk [vmem:[%s950_s28] sm:$0xff] %vm560_vm2, %v434_v24  ;;  %v445_v28 = vadd.f32 %v763_v27, %v945_v18  ;;  %v779_v29 = vpop.f32.mrf.mxu1 }
  0xd7   : > { %577 = vst.msk [vmem:[%s950_s28 + $0x80] sm:$0xff] %vm560_vm2, %v498_v26  ;;  %v509_v30 = vadd.f32 %v779_v29, %v945_v18  ;;  %v436_v31 = vpop.f32.mrf.mxu0 }
  0xd8   : > { %564 = vst.msk [vmem:[%s950_s28 + $0x18] sm:$0xff] %vm560_vm2, %v445_v28  ;;  %v437_v32 = vadd.f32 %v945_v18, %v436_v31  ;;  %v500_v33 = vpop.f32.mrf.mxu1 }
  0xd9   : > { %580 = vst.msk [vmem:[%s950_s28 + $0x98] sm:$0xff] %vm560_vm2, %v509_v30  ;;  %v501_v34 = vadd.f32 %v945_v18, %v500_v33  ;;  %v766_v35 = vpop.f32.mrf.mxu0 }
  0xda   : > { %562 = vst.msk [vmem:[%s950_s28 + $0x8] sm:$0xff] %vm560_vm2, %v437_v32  ;;  %v458_v36 = vadd.f32 %v766_v35, %v945_v18  ;;  %v782_v37 = vpop.f32.mrf.mxu1 }
  0xdb   : > { %578 = vst.msk [vmem:[%s950_s28 + $0x88] sm:$0xff] %vm560_vm2, %v501_v34  ;;  %v522_v38 = vadd.f32 %v782_v37, %v945_v18  ;;  %v449_v39 = vpop.f32.mrf.mxu0 }
  0xdc   : > { %567 = vst.msk [vmem:[%s950_s28 + $0x30] sm:$0xff] %vm560_vm2, %v458_v36  ;;  %v450_v40 = vadd.f32 %v945_v18, %v449_v39  ;;  %v513_v41 = vpop.f32.mrf.mxu1 }
  0xdd   : > { %583 = vst.msk [vmem:[%s950_s28 + $0xb0] sm:$0xff] %vm560_vm2, %v522_v38  ;;  %v514_v42 = vadd.f32 %v945_v18, %v513_v41  ;;  %v767_v43 = vpop.f32.mrf.mxu0 }
  0xde   : > { %565 = vst.msk [vmem:[%s950_s28 + $0x20] sm:$0xff] %vm560_vm2, %v450_v40  ;;  %v461_v44 = vadd.f32 %v767_v43, %v945_v18  ;;  %v783_v45 = vpop.f32.mrf.mxu1 }
  0xdf   : > { %581 = vst.msk [vmem:[%s950_s28 + $0xa0] sm:$0xff] %vm560_vm2, %v514_v42  ;;  %v525_v46 = vadd.f32 %v783_v45, %v945_v18  ;;  %v452_v47 = vpop.f32.mrf.mxu0 }
  0xe0   : > { %568 = vst.msk [vmem:[%s950_s28 + $0x38] sm:$0xff] %vm560_vm2, %v461_v44  ;;  %v453_v48 = vadd.f32 %v945_v18, %v452_v47  ;;  %v516_v49 = vpop.f32.mrf.mxu1 }
  0xe1   : > { %584 = vst.msk [vmem:[%s950_s28 + $0xb8] sm:$0xff] %vm560_vm2, %v525_v46  ;;  %v517_v50 = vadd.f32 %v945_v18, %v516_v49  ;;  %v770_v51 = vpop.f32.mrf.mxu0 }
  0xe2   : > { %566 = vst.msk [vmem:[%s950_s28 + $0x28] sm:$0xff] %vm560_vm2, %v453_v48  ;;  %v474_v52 = vadd.f32 %v770_v51, %v945_v18  ;;  %v786_v53 = vpop.f32.mrf.mxu1 }
  0xe3   : > { %582 = vst.msk [vmem:[%s950_s28 + $0xa8] sm:$0xff] %vm560_vm2, %v517_v50  ;;  %v538_v54 = vadd.f32 %v786_v53, %v945_v18  ;;  %v465_v55 = vpop.f32.mrf.mxu0 }
  0xe4   : > { %571 = vst.msk [vmem:[%s950_s28 + $0x50] sm:$0xff] %vm560_vm2, %v474_v52  ;;  %v466_v56 = vadd.f32 %v945_v18, %v465_v55  ;;  %v529_v57 = vpop.f32.mrf.mxu1 }
  0xe5   : > { %587 = vst.msk [vmem:[%s950_s28 + $0xd0] sm:$0xff] %vm560_vm2, %v538_v54  ;;  %v530_v58 = vadd.f32 %v945_v18, %v529_v57  ;;  %v771_v59 = vpop.f32.mrf.mxu0 }
  0xe6   : > { %569 = vst.msk [vmem:[%s950_s28 + $0x40] sm:$0xff] %vm560_vm2, %v466_v56  ;;  %v477_v60 = vadd.f32 %v771_v59, %v945_v18  ;;  %v787_v61 = vpop.f32.mrf.mxu1 }
  0xe7   : > { %585 = vst.msk [vmem:[%s950_s28 + $0xc0] sm:$0xff] %vm560_vm2, %v530_v58  ;;  %v541_v62 = vadd.f32 %v787_v61, %v945_v18  ;;  %v468_v63 = vpop.f32.mrf.mxu0 }
  0xe8   : > { %572 = vst.msk [vmem:[%s950_s28 + $0x58] sm:$0xff] %vm560_vm2, %v477_v60  ;;  %v469_v0 = vadd.f32 %v945_v18, %v468_v63  ;;  %v532_v1 = vpop.f32.mrf.mxu1 }
  0xe9   : > { %588 = vst.msk [vmem:[%s950_s28 + $0xd8] sm:$0xff] %vm560_vm2, %v541_v62  ;;  %v533_v2 = vadd.f32 %v945_v18, %v532_v1  ;;  %v774_v3 = vpop.f32.mrf.mxu0 }
  0xea   : > { %570 = vst.msk [vmem:[%s950_s28 + $0x48] sm:$0xff] %vm560_vm2, %v469_v0  ;;  %v490_v4 = vadd.f32 %v774_v3, %v945_v18  ;;  %v790_v5 = vpop.f32.mrf.mxu1 }
  0xeb   : > { %586 = vst.msk [vmem:[%s950_s28 + $0xc8] sm:$0xff] %vm560_vm2, %v533_v2  ;;  %v554_v6 = vadd.f32 %v790_v5, %v945_v18  ;;  %v481_v7 = vpop.f32.mrf.mxu0 }
  0xec   : > { %575 = vst.msk [vmem:[%s950_s28 + $0x70] sm:$0xff] %vm560_vm2, %v490_v4  ;;  %v482_v8 = vadd.f32 %v945_v18, %v481_v7  ;;  %v545_v9 = vpop.f32.mrf.mxu1 }
  0xed   : > { %591 = vst.msk [vmem:[%s950_s28 + $0xf0] sm:$0xff] %vm560_vm2, %v554_v6  ;;  %v546_v10 = vadd.f32 %v945_v18, %v545_v9  ;;  %v775_v11 = vpop.f32.mrf.mxu0 }
  0xee   : > { %573 = vst.msk [vmem:[%s950_s28 + $0x60] sm:$0xff] %vm560_vm2, %v482_v8  ;;  %v493_v12 = vadd.f32 %v775_v11, %v945_v18  ;;  %v791_v13 = vpop.f32.mrf.mxu1 }
  0xef   : > { %589 = vst.msk [vmem:[%s950_s28 + $0xe0] sm:$0xff] %vm560_vm2, %v546_v10  ;;  %v557_v14 = vadd.f32 %v791_v13, %v945_v18  ;;  %v484_v15 = vpop.f32.mrf.mxu0 }
  0xf0   : > { %576 = vst.msk [vmem:[%s950_s28 + $0x78] sm:$0xff] %vm560_vm2, %v493_v12  ;;  %v485_v16 = vadd.f32 %v945_v18, %v484_v15  ;;  %v548_v17 = vpop.f32.mrf.mxu1 }
  0xf1   : > { %592 = vst.msk [vmem:[%s950_s28 + $0xf8] sm:$0xff] %vm560_vm2, %v557_v14  ;;  %v549_v19 = vadd.f32 %v945_v18, %v548_v17 }
  0xf2   : > { %574 = vst.msk [vmem:[%s950_s28 + $0x68] sm:$0xff] %vm560_vm2, %v485_v16 }
  0xf3   : > { %590 = vst.msk [vmem:[%s950_s28 + $0xe8] sm:$0xff] %vm560_vm2, %v549_v19 }
  0xf4 PF: > { %s13_s14 = sadd.s32 1, %s858_s14   ;;  %s1061_s12 = smov %s854_s13 }
  0xf5   : > { %p10_p5 = scmp.ge.s32.totalorder %s13_s14, 4   ;;  %s1062_s13 = smov %s1064_s15 }
  0xf7   :  { %12 = sbr.rel (!%p10_p5) target bundleno = 2 (0x2), region = 68 }

</bundles_post_ra>
